<compile_context>
chip_gen: v7x
topology: tpu7x:2x2x1
jax: 0.10.0
libtpu: 0.0.40
codegen_flags: <defaults>
</compile_context>

<pallas_src>
import functools

import jax
import jax.numpy as jnp
from jax.experimental import pallas as pl
from jax.experimental.pallas import tpu as pltpu

_LANE = 128
_NUM_CLASSES = 10


# ----------------------------------------------------------------------------
# Small planning helpers.
# ----------------------------------------------------------------------------
def _round_up(x, m):
    return -(-x // m) * m


def _plan_m_blocks(m, mb_cap=1024):
    """128-multiple M block; >=2 blocks once m >= 256 (v7x megacore), capped for VMEM."""
    half = (m + 1) // 2
    mb = max(_LANE, min(mb_cap, _round_up(half, _LANE)))
    nb = -(-m // mb)
    return mb, nb


def _pick_batch_block(n, unit=8, target=512):
    """FC batch block: a divisor of n, and >=2 blocks once n is large enough."""
    if n < 2 * unit or n % unit != 0:
        return n
    cap = min(target, _round_up(n // 2, unit))
    for cand in range(cap, 0, -unit):
        if n % cand == 0:
            return cand
    return n


def _quadrant_blocked_patches(p, mb, nb):
    """(4, K, M) quadrant-major patches -> (K, nb*4*mb); column index = i*4*mb + q*mb + j.

    M is zero-padded to nb*mb so every in-kernel quadrant lane slice is 128-aligned and the
    conv writeback is lane-dense.  Padded columns are sliced off by the wrappers.
    """
    _, k, m = p.shape
    mp = mb * nb
    p = jnp.pad(p, ((0, 0), (0, 0), (0, mp - m)))
    p = p.reshape(4, k, nb, mb).transpose(1, 2, 0, 3)        # (K, nb, 4, mb)
    return p.reshape(k, nb * 4 * mb), mp


# ----------------------------------------------------------------------------
# Pallas kernel A: conv (as OC x 4*mb matmul) + bias + 2x2 max-pool + ReLU.
# One grid step per M block; the 4 pooling quadrants are lane-concatenated in the RHS.
# ----------------------------------------------------------------------------
def _conv_pool_relu_kernel(p_ref, w_ref, b_ref, o_ref):
    mb = o_ref.shape[1]
    acc = jnp.dot(w_ref[...], p_ref[...],
                  preferred_element_type=jnp.float32)         # (OC, 4*mb), one MXU matmul
    pooled = jnp.maximum(jnp.maximum(acc[:, 0 * mb:1 * mb], acc[:, 1 * mb:2 * mb]),
                         jnp.maximum(acc[:, 2 * mb:3 * mb], acc[:, 3 * mb:4 * mb]))
    # relu(max_q(conv_q) + b) == max_pool(relu(conv + b)): bias constant over quadrants.
    o_ref[...] = jnp.maximum(pooled + b_ref[...], 0.0)


def conv_pool_relu(patches, w2d, bias):
    """patches: (4, K, M) quadrant-major im2col; w2d: (OC, K); bias: (OC, 1).

    Returns (OC, M) = max_pool2(relu(conv + b)), columns ordered (n, oh//2, ow//2).
    """
    _, k, m = patches.shape
    oc = w2d.shape[0]
    mb, nb = _plan_m_blocks(m)
    pq, mp = _quadrant_blocked_patches(patches, mb, nb)
    cost = pl.CostEstimate(
        flops=int(2 * oc * k * 4 * mp + 4 * oc * mp),
        transcendentals=0,
        bytes_accessed=int(4 * (pq.size + w2d.size + bias.size + oc * mp)))
    out = pl.pallas_call(
        _conv_pool_relu_kernel,
        out_shape=jax.ShapeDtypeStruct((oc, mp), jnp.float32),
        grid=(nb,),
        in_specs=[
            pl.BlockSpec((k, 4 * mb), lambda i: (0, i)),
            pl.BlockSpec((oc, k), lambda i: (0, 0)),
            pl.BlockSpec((oc, 1), lambda i: (0, 0)),
        ],
        out_specs=pl.BlockSpec((oc, mb), lambda i: (0, i)),
        compiler_params=pltpu.CompilerParams(
            dimension_semantics=("parallel",),
            allow_input_fusion=[True, False, False]),
        cost_estimate=cost,
    )(pq, w2d, bias)
    return out[:, :m]


# ----------------------------------------------------------------------------
# Pallas kernel B: conv + bias + 2x2 max-pool + ReLU + training-mode BatchNorm.
# Single full-M block (BN needs whole-batch statistics); quadrants lane-concatenated.
# ----------------------------------------------------------------------------
def _conv_pool_relu_bn_kernel(p_ref, w_ref, b_ref, g_ref, beta_ref, o_ref, *, m_valid, eps):
    mp = o_ref.shape[1]
    acc = jnp.dot(w_ref[...], p_ref[...],
                  preferred_element_type=jnp.float32)         # (OC, 4*Mp), one MXU matmul
    y = jnp.maximum(jnp.maximum(acc[:, 0 * mp:1 * mp], acc[:, 1 * mp:2 * mp]),
                    jnp.maximum(acc[:, 2 * mp:3 * mp], acc[:, 3 * mp:4 * mp]))
    y = jnp.maximum(y + b_ref[...], 0.0)                      # pooled + relu, (OC, Mp)
    # Per-channel batch stats over the *valid* lanes only (explicit mask: padded lanes hold
    # relu(bias), never trusted).  Variance via E[(y-mu)^2] so it is >= 0 by construction.
    valid = jax.lax.broadcasted_iota(jnp.int32, y.shape, 1) < m_valid
    cnt = jnp.float32(m_valid)
    mu = jnp.sum(jnp.where(valid, y, 0.0), axis=1, keepdims=True) / cnt
    d = jnp.where(valid, y - mu, 0.0)
    var = jnp.sum(d * d, axis=1, keepdims=True) / cnt          # biased (PyTorch training BN)
    inv = jax.lax.rsqrt(var + eps)
    o_ref[...] = (y - mu) * inv * g_ref[...] + beta_ref[...]


def conv_pool_relu_bn(patches, w2d, bias, gamma, beta, eps=1e-5):
    _, k, m = patches.shape
    oc = w2d.shape[0]
    mp = _round_up(m, _LANE)
    pq, _ = _quadrant_blocked_patches(patches, mp, 1)
    # Full-M residency: set the scoped VMEM limit explicitly (review: v5e 16 MiB default,
    # v7x 64 MiB physical).  Large-batch M-tiling is a TODO (see module docstring).
    block_bytes = 4 * (k * 4 * mp + oc * mp + oc * (k + 3))
    vmem_limit = int(min(max(2 * block_bytes + (8 << 20), 32 << 20), 64 << 20))
    cost = pl.CostEstimate(
        flops=int(2 * oc * k * 4 * mp + 10 * oc * mp),
        transcendentals=int(oc),
        bytes_accessed=int(4 * (pq.size + w2d.size + oc * (mp + 3))))
    out = pl.pallas_call(
        functools.partial(_conv_pool_relu_bn_kernel, m_valid=m, eps=eps),
        out_shape=jax.ShapeDtypeStruct((oc, mp), jnp.float32),
        grid=(1,),
        in_specs=[
            pl.BlockSpec((k, 4 * mp), lambda i: (0, 0)),
            pl.BlockSpec((oc, k), lambda i: (0, 0)),
            pl.BlockSpec((oc, 1), lambda i: (0, 0)),
            pl.BlockSpec((oc, 1), lambda i: (0, 0)),
            pl.BlockSpec((oc, 1), lambda i: (0, 0)),
        ],
        out_specs=pl.BlockSpec((oc, mp), lambda i: (0, 0)),
        compiler_params=pltpu.CompilerParams(
            dimension_semantics=("arbitrary",),
            vmem_limit_bytes=vmem_limit,
            allow_input_fusion=[True, False, False, False, False]),
        cost_estimate=cost,
    )(pq, w2d, bias, gamma, beta)
    return out[:, :m]


# ----------------------------------------------------------------------------
# Pallas kernel C: fc1 + ReLU + fc2 + ReLU + fc3 fused into one call.
# All three (tiny) weight matrices are VMEM-resident; fc3 is padded to 128 output lanes.
# ----------------------------------------------------------------------------
def _fc_stack_kernel(f_ref, w1_ref, b1_ref, w2_ref, b2_ref, w3_ref, b3_ref, o_ref):
    h = jnp.maximum(jnp.dot(f_ref[...], w1_ref[...],
                            preferred_element_type=jnp.float32) + b1_ref[...], 0.0)
    h = jnp.maximum(jnp.dot(h, w2_ref[...],
                            preferred_element_type=jnp.float32) + b2_ref[...], 0.0)
    o_ref[...] = jnp.dot(h, w3_ref[...],
                         preferred_element_type=jnp.float32) + b3_ref[...]


def fc_stack(feature, w1, b1, w2, b2, w3, b3):
    n, d = feature.shape
    h1, h2, h3 = w1.shape[1], w2.shape[1], w3.shape[1]
    nb = _pick_batch_block(n)
    cost = pl.CostEstimate(
        flops=int(2 * n * (d * h1 + h1 * h2 + h2 * h3)),
        transcendentals=0,
        bytes_accessed=int(4 * (feature.size + w1.size + b1.size + w2.size + b2.size
                                + w3.size + b3.size + n * h3)))
    return pl.pallas_call(
        _fc_stack_kernel,
        out_shape=jax.ShapeDtypeStruct((n, h3), jnp.float32),
        grid=(n // nb,),
        in_specs=[
            pl.BlockSpec((nb, d), lambda i: (i, 0)),
            pl.BlockSpec((d, h1), lambda i: (0, 0)),
            pl.BlockSpec((1, h1), lambda i: (0, 0)),
            pl.BlockSpec((h1, h2), lambda i: (0, 0)),
            pl.BlockSpec((1, h2), lambda i: (0, 0)),
            pl.BlockSpec((h2, h3), lambda i: (0, 0)),
            pl.BlockSpec((1, h3), lambda i: (0, 0)),
        ],
        out_specs=pl.BlockSpec((nb, h3), lambda i: (i, 0)),
        compiler_params=pltpu.CompilerParams(dimension_semantics=("parallel",)),
        cost_estimate=cost,
    )(feature, w1, b1, w2, b2, w3, b3)


# ----------------------------------------------------------------------------
# XLA glue: quadrant-major im2col (layout-only data movement, no FLOPs).
# ----------------------------------------------------------------------------
def im2col_pool_quadrants(x_cnhw, k):
    """x: (C, N, H, W) -> (4, C*k*k, N*(OH//2)*(OW//2)).

    Quadrant axis enumerates the 2x2 pooling phase (ph, pw); K rows are c-major,
    (kh, kw)-minor (matches weight.reshape(OC, C*k*k)); columns are (n, oh//2, ow//2).
    """
    c, n, h, w = x_cnhw.shape
    oh, ow = h - k + 1, w - k + 1
    assert oh % 2 == 0 and ow % 2 == 0
    oh2, ow2 = oh // 2, ow // 2
    cols = [x_cnhw[:, :, i:i + oh, j:j + ow]
            for i in range(k) for j in range(k)]            # each (C, N, OH, OW)
    p = jnp.stack(cols, axis=1)                              # (C, k*k, N, OH, OW)
    p = p.reshape(c * k * k, n, oh2, 2, ow2, 2)              # split pooling phases
    p = p.transpose(3, 5, 0, 1, 2, 4)                        # (ph, pw, K, N, oh2, ow2)
    return p.reshape(4, c * k * k, n * oh2 * ow2)


# ----------------------------------------------------------------------------
# Parameters (PyTorch layout) + one-time kernel-ready re-layout.
# ----------------------------------------------------------------------------
def init_params(key, input_channels=3):
    ks = jax.random.split(key, 10)
    return {
        "conv1_w": 0.1 * jax.random.normal(ks[0], (6, input_channels, 5, 5), jnp.float32),
        "conv1_b": 0.1 * jax.random.normal(ks[1], (6,), jnp.float32),
        "conv2_w": 0.1 * jax.random.normal(ks[2], (16, 6, 5, 5), jnp.float32),
        "conv2_b": 0.1 * jax.random.normal(ks[3], (16,), jnp.float32),
        "bn_gamma": jnp.ones((16,), jnp.float32),
        "bn_beta": jnp.zeros((16,), jnp.float32),
        "fc1_w": 0.05 * jax.random.normal(ks[4], (16 * 5 * 5, 120), jnp.float32),
        "fc1_b": 0.05 * jax.random.normal(ks[5], (120,), jnp.float32),
        "fc2_w": 0.05 * jax.random.normal(ks[6], (120, 84), jnp.float32),
        "fc2_b": 0.05 * jax.random.normal(ks[7], (84,), jnp.float32),
        "fc3_w": 0.05 * jax.random.normal(ks[8], (84, 10), jnp.float32),
        "fc3_b": 0.05 * jax.random.normal(ks[9], (10,), jnp.float32),
    }


def prepare_params(p):
    """One-time re-layout into kernel-ready 2-D shapes (never repeated per call)."""
    oc1, c1, kh1, kw1 = p["conv1_w"].shape
    oc2, c2, kh2, kw2 = p["conv2_w"].shape
    h3 = p["fc3_w"].shape[1]
    h3p = _round_up(max(h3, _LANE), _LANE)          # lane-dense fc3 writeback (unmasked vst)
    return {
        "conv1_w2d": p["conv1_w"].reshape(oc1, c1 * kh1 * kw1),
        "conv1_b": p["conv1_b"].reshape(oc1, 1),
        "conv2_w2d": p["conv2_w"].reshape(oc2, c2 * kh2 * kw2),
        "conv2_b": p["conv2_b"].reshape(oc2, 1),
        "bn_gamma": p["bn_gamma"].reshape(oc2, 1),
        "bn_beta": p["bn_beta"].reshape(oc2, 1),
        "fc1_w": p["fc1_w"], "fc1_b": p["fc1_b"].reshape(1, -1),
        "fc2_w": p["fc2_w"], "fc2_b": p["fc2_b"].reshape(1, -1),
        "fc3_wp": jnp.pad(p["fc3_w"], ((0, 0), (0, h3p - h3))),
        "fc3_bp": jnp.pad(p["fc3_b"].reshape(1, -1), ((0, 0), (0, h3p - h3))),
    }


# ----------------------------------------------------------------------------
# Forward pass: 3 fused pallas_calls (conv1+pool, conv2+pool+BN, fc1+fc2+fc3).
# ----------------------------------------------------------------------------
def lenet_forward(kp, x):
    """x: (N, C, 32, 32) NCHW f32 -> (logits (N, 10), feature (N, 400))."""
    n = x.shape[0]
    k = 5
    # conv1 + ReLU + max_pool2 (fused): output (6, N*196), channel-major.
    x_cnhw = x.transpose(1, 0, 2, 3)                          # (C, N, H, W)
    p1 = im2col_pool_quadrants(x_cnhw, k)                     # (4, C*25, N*196)
    c1 = conv_pool_relu(p1, kp["conv1_w2d"], kp["conv1_b"])   # (6, N*196)
    # conv2 + ReLU + max_pool2 + BatchNorm (fused): output (16, N*25).
    c1_cnhw = c1.reshape(6, n, 14, 14)                        # already channel-major
    p2 = im2col_pool_quadrants(c1_cnhw, k)                    # (4, 150, N*25)
    c2 = conv_pool_relu_bn(p2, kp["conv2_w2d"], kp["conv2_b"],
                           kp["bn_gamma"], kp["bn_beta"])     # (16, N*25)
    # Flatten to PyTorch's x.view(N, -1) ordering (tiny layout-only transpose).
    feature = c2.reshape(16, n, 5, 5).transpose(1, 0, 2, 3).reshape(n, 16 * 5 * 5)
    # fc1 -> ReLU -> fc2 -> ReLU -> fc3 (padded to 128 lanes), all inside one pallas_call.
    logits_p = fc_stack(feature, kp["fc1_w"], kp["fc1_b"], kp["fc2_w"], kp["fc2_b"],
                        kp["fc3_wp"], kp["fc3_bp"])
    return logits_p[:, :_NUM_CLASSES], feature


# ----------------------------------------------------------------------------
# Pure-XLA reference (mirrors the PyTorch module) for the self-check.
# ----------------------------------------------------------------------------
def _reference_forward(p, x):
    dn = ("NCHW", "OIHW", "NCHW")
    y = jax.lax.conv_general_dilated(x, p["conv1_w"], (1, 1), "VALID",
                                     dimension_numbers=dn)
    y = jax.nn.relu(y + p["conv1_b"].reshape(1, -1, 1, 1))
    n, c, h, w = y.shape
    y = y.reshape(n, c, h // 2, 2, w // 2, 2).max(axis=(3, 5))
    y = jax.lax.conv_general_dilated(y, p["conv2_w"], (1, 1), "VALID",
                                     dimension_numbers=dn)
    y = jax.nn.relu(y + p["conv2_b"].reshape(1, -1, 1, 1))
    n, c, h, w = y.shape
    y = y.reshape(n, c, h // 2, 2, w // 2, 2).max(axis=(3, 5))
    mu = y.mean(axis=(0, 2, 3), keepdims=True)
    var = y.var(axis=(0, 2, 3), keepdims=True)
    y = (y - mu) * jax.lax.rsqrt(var + 1e-5)
    y = y * p["bn_gamma"].reshape(1, -1, 1, 1) + p["bn_beta"].reshape(1, -1, 1, 1)
    feature = y.reshape(n, -1)
    h1 = jax.nn.relu(feature @ p["fc1_w"] + p["fc1_b"])
    h2 = jax.nn.relu(h1 @ p["fc2_w"] + p["fc2_b"])
    logits = h2 @ p["fc3_w"] + p["fc3_b"]
    return logits, feature


if __name__ == "__main__":
    key = jax.random.PRNGKey(0)
    k_param, k_x = jax.random.split(key)
    raw_params = init_params(k_param, input_channels=3)
    kparams = prepare_params(raw_params)
    # LeNet's fc1 (16*5*5) implies 32x32 spatial input; small batch of 2.
    x = jax.random.normal(k_x, (2, 3, 32, 32), jnp.float32)

    fwd = jax.jit(lenet_forward)
    logits, feature = fwd(kparams, x)
    jax.block_until_ready((logits, feature))

    assert logits.shape == (2, 10), logits.shape
    assert feature.shape == (2, 400), feature.shape
    assert bool(jnp.all(jnp.isfinite(logits)))

    # Numerical self-check against the pure-XLA reference.
    ref_logits, ref_feature = _reference_forward(raw_params, x)
    assert bool(jnp.allclose(feature, ref_feature, rtol=5e-3, atol=5e-3))
    assert bool(jnp.allclose(logits, ref_logits, rtol=5e-3, atol=5e-3))

    print("KERNEL_OK")
</pallas_src>

<mosaic_0001>
module attributes {stable_mosaic.version = 11 : i64} {
  func.func @_conv_pool_relu_kernel(%arg0: i32, %arg1: memref<75x1024xf32, #tpu.memory_space<vmem>>, %arg2: memref<6x75xf32, #tpu.memory_space<vmem>>, %arg3: memref<6x1xf32, #tpu.memory_space<vmem>>, %arg4: memref<6x256xf32, #tpu.memory_space<vmem>>) attributes {dimension_semantics = [#tpu.dimension_semantics<parallel>], iteration_bounds = array<i64: 2>, scalar_prefetch = 0 : i64, scratch_operands = 0 : i64, tpu.core_type = #tpu.core_type<tc>, window_params = [{transform_indices = @transform_0, window_bounds = array<i64: 75, 1024>}, {pipeline_mode = #tpu.pipeline_mode<synchronous>, transform_indices = @transform_1, window_bounds = array<i64: 6, 75>}, {pipeline_mode = #tpu.pipeline_mode<synchronous>, transform_indices = @transform_2, window_bounds = array<i64: 6, 1>}, {transform_indices = @transform_3, window_bounds = array<i64: 6, 256>}]} {
    %c0 = arith.constant 0 : index
    %c0_0 = arith.constant 0 : index
    %0 = vector.load %arg2[%c0, %c0_0] : memref<6x75xf32, #tpu.memory_space<vmem>>, vector<6x75xf32>
    %c0_1 = arith.constant 0 : index
    %c0_2 = arith.constant 0 : index
    %1 = vector.load %arg1[%c0_1, %c0_2] : memref<75x1024xf32, #tpu.memory_space<vmem>>, vector<75x1024xf32>
    %cst = arith.constant dense<0.000000e+00> : vector<6x1024xf32>
    %2 = tpu.matmul %0, %1, %cst {dimension_numbers = #tpu.dot_dimension_numbers<[1], [0], [0], [1], [0, 0, 1, 1], [], []>} : vector<6x75xf32>, vector<75x1024xf32>, vector<6x1024xf32> -> vector<6x1024xf32>
    %3 = vector.extract_strided_slice %2 {offsets = [0, 0], sizes = [6, 256], strides = [1, 1]} : vector<6x1024xf32> to vector<6x256xf32>
    %4 = vector.extract_strided_slice %2 {offsets = [0, 256], sizes = [6, 256], strides = [1, 1]} : vector<6x1024xf32> to vector<6x256xf32>
    %5 = arith.maximumf %3, %4 : vector<6x256xf32>
    %6 = vector.extract_strided_slice %2 {offsets = [0, 512], sizes = [6, 256], strides = [1, 1]} : vector<6x1024xf32> to vector<6x256xf32>
    %7 = vector.extract_strided_slice %2 {offsets = [0, 768], sizes = [6, 256], strides = [1, 1]} : vector<6x1024xf32> to vector<6x256xf32>
    %8 = arith.maximumf %6, %7 : vector<6x256xf32>
    %9 = arith.maximumf %5, %8 : vector<6x256xf32>
    %c0_3 = arith.constant 0 : index
    %c0_4 = arith.constant 0 : index
    %10 = vector.load %arg3[%c0_3, %c0_4] : memref<6x1xf32, #tpu.memory_space<vmem>>, vector<6x1xf32>
    %11 = vector.broadcast %10 : vector<6x1xf32> to vector<6x256xf32>
    %12 = arith.addf %9, %11 : vector<6x256xf32>
    %cst_5 = arith.constant 0.000000e+00 : f32
    %13 = vector.broadcast %cst_5 : f32 to vector<6x256xf32>
    %14 = arith.maximumf %12, %13 : vector<6x256xf32>
    %c0_6 = arith.constant 0 : index
    %c0_7 = arith.constant 0 : index
    %15 = vector.load %arg4[%c0_6, %c0_7] : memref<6x256xf32, #tpu.memory_space<vmem>>, vector<6x256xf32>
    tpu.vector_store %arg4[%c0_6, %c0_7], %14 {strides = array<i32>} : memref<6x256xf32, #tpu.memory_space<vmem>>, vector<6x256xf32>,
    return
  }
  func.func @transform_0(%arg0: i32) -> (i32, i32) {
    %c0_i32 = arith.constant 0 : i32
    %c0_i32_0 = arith.constant 0 : i32
    return %c0_i32, %arg0 : i32, i32
  }
  func.func @transform_1(%arg0: i32) -> (i32, i32) {
    %c0_i32 = arith.constant 0 : i32
    %c0_i32_0 = arith.constant 0 : i32
    %c0_i32_1 = arith.constant 0 : i32
    return %c0_i32, %c0_i32_0 : i32, i32
  }
  func.func @transform_2(%arg0: i32) -> (i32, i32) {
    %c0_i32 = arith.constant 0 : i32
    %c0_i32_0 = arith.constant 0 : i32
    %c0_i32_1 = arith.constant 0 : i32
    return %c0_i32, %c0_i32_0 : i32, i32
  }
  func.func @transform_3(%arg0: i32) -> (i32, i32) {
    %c0_i32 = arith.constant 0 : i32
    %c0_i32_0 = arith.constant 0 : i32
    return %c0_i32, %arg0 : i32, i32
  }
}

module attributes {stable_mosaic.version = 11 : i64} {
  func.func @_conv_pool_relu_bn_kernel(%arg0: i32, %arg1: memref<150x512xf32, #tpu.memory_space<vmem>>, %arg2: memref<16x150xf32, #tpu.memory_space<vmem>>, %arg3: memref<16x1xf32, #tpu.memory_space<vmem>>, %arg4: memref<16x1xf32, #tpu.memory_space<vmem>>, %arg5: memref<16x1xf32, #tpu.memory_space<vmem>>, %arg6: memref<16x128xf32, #tpu.memory_space<vmem>>) attributes {dimension_semantics = [#tpu.dimension_semantics<arbitrary>], iteration_bounds = array<i64: 1>, scalar_prefetch = 0 : i64, scratch_operands = 0 : i64, tpu.core_type = #tpu.core_type<tc>, window_params = [{pipeline_mode = #tpu.pipeline_mode<synchronous>, transform_indices = @transform_0, window_bounds = array<i64: 150, 512>}, {pipeline_mode = #tpu.pipeline_mode<synchronous>, transform_indices = @transform_1, window_bounds = array<i64: 16, 150>}, {pipeline_mode = #tpu.pipeline_mode<synchronous>, transform_indices = @transform_2, window_bounds = array<i64: 16, 1>}, {pipeline_mode = #tpu.pipeline_mode<synchronous>, transform_indices = @transform_3, window_bounds = array<i64: 16, 1>}, {pipeline_mode = #tpu.pipeline_mode<synchronous>, transform_indices = @transform_4, window_bounds = array<i64: 16, 1>}, {pipeline_mode = #tpu.pipeline_mode<synchronous>, transform_indices = @transform_5, window_bounds = array<i64: 16, 128>}]} {
    %c0 = arith.constant 0 : index
    %c0_0 = arith.constant 0 : index
    %0 = vector.load %arg2[%c0, %c0_0] : memref<16x150xf32, #tpu.memory_space<vmem>>, vector<16x150xf32>
    %c0_1 = arith.constant 0 : index
    %c0_2 = arith.constant 0 : index
    %1 = vector.load %arg1[%c0_1, %c0_2] : memref<150x512xf32, #tpu.memory_space<vmem>>, vector<150x512xf32>
    %cst = arith.constant dense<0.000000e+00> : vector<16x512xf32>
    %2 = tpu.matmul %0, %1, %cst {dimension_numbers = #tpu.dot_dimension_numbers<[1], [0], [0], [1], [0, 0, 1, 1], [], []>} : vector<16x150xf32>, vector<150x512xf32>, vector<16x512xf32> -> vector<16x512xf32>
    %3 = vector.extract_strided_slice %2 {offsets = [0, 0], sizes = [16, 128], strides = [1, 1]} : vector<16x512xf32> to vector<16x128xf32>
    %4 = vector.extract_strided_slice %2 {offsets = [0, 128], sizes = [16, 128], strides = [1, 1]} : vector<16x512xf32> to vector<16x128xf32>
    %5 = arith.maximumf %3, %4 : vector<16x128xf32>
    %6 = vector.extract_strided_slice %2 {offsets = [0, 256], sizes = [16, 128], strides = [1, 1]} : vector<16x512xf32> to vector<16x128xf32>
    %7 = vector.extract_strided_slice %2 {offsets = [0, 384], sizes = [16, 128], strides = [1, 1]} : vector<16x512xf32> to vector<16x128xf32>
    %8 = arith.maximumf %6, %7 : vector<16x128xf32>
    %9 = arith.maximumf %5, %8 : vector<16x128xf32>
    %c0_3 = arith.constant 0 : index
    %c0_4 = arith.constant 0 : index
    %10 = vector.load %arg3[%c0_3, %c0_4] : memref<16x1xf32, #tpu.memory_space<vmem>>, vector<16x1xf32>
    %11 = vector.broadcast %10 : vector<16x1xf32> to vector<16x128xf32>
    %12 = arith.addf %9, %11 : vector<16x128xf32>
    %cst_5 = arith.constant 0.000000e+00 : f32
    %13 = vector.broadcast %cst_5 : f32 to vector<16x128xf32>
    %14 = arith.maximumf %12, %13 : vector<16x128xf32>
    %15 = tpu.iota {dimensions = array<i32: 1>} : vector<16x128xi32>
    %c50_i32 = arith.constant 50 : i32
    %16 = vector.broadcast %c50_i32 : i32 to vector<16x128xi32>
    %17 = arith.cmpi slt, %15, %16 : vector<16x128xi32>
    %cst_6 = arith.constant 0.000000e+00 : f32
    %18 = vector.broadcast %cst_6 : f32 to vector<16x128xf32>
    %19 = arith.select %17, %14, %18 : vector<16x128xi1>, vector<16x128xf32>
    %cst_7 = arith.constant dense<0.000000e+00> : vector<16xf32>
    %20 = vector.multi_reduction <add>, %19, %cst_7 [1] : vector<16x128xf32> to vector<16xf32>
    %21 = vector.shape_cast %20 : vector<16xf32> to vector<16x1xf32>
    %cst_8 = arith.constant 5.000000e+01 : f32
    %22 = vector.broadcast %cst_8 : f32 to vector<16x1xf32>
    %23 = arith.divf %21, %22 : vector<16x1xf32>
    %24 = vector.broadcast %23 : vector<16x1xf32> to vector<16x128xf32>
    %25 = arith.subf %14, %24 : vector<16x128xf32>
    %cst_9 = arith.constant 0.000000e+00 : f32
    %26 = vector.broadcast %cst_9 : f32 to vector<16x128xf32>
    %27 = arith.select %17, %25, %26 : vector<16x128xi1>, vector<16x128xf32>
    %28 = arith.mulf %27, %27 : vector<16x128xf32>
    %cst_10 = arith.constant dense<0.000000e+00> : vector<16xf32>
    %29 = vector.multi_reduction <add>, %28, %cst_10 [1] : vector<16x128xf32> to vector<16xf32>
    %30 = vector.shape_cast %29 : vector<16xf32> to vector<16x1xf32>
    %cst_11 = arith.constant 5.000000e+01 : f32
    %31 = vector.broadcast %cst_11 : f32 to vector<16x1xf32>
    %32 = arith.divf %30, %31 : vector<16x1xf32>
    %cst_12 = arith.constant 9.99999974E-6 : f32
    %33 = vector.broadcast %cst_12 : f32 to vector<16x1xf32>
    %34 = arith.addf %32, %33 : vector<16x1xf32>
    %35 = math.rsqrt %34 : vector<16x1xf32>
    %36 = vector.broadcast %23 : vector<16x1xf32> to vector<16x128xf32>
    %37 = arith.subf %14, %36 : vector<16x128xf32>
    %38 = vector.broadcast %35 : vector<16x1xf32> to vector<16x128xf32>
    %39 = arith.mulf %37, %38 : vector<16x128xf32>
    %c0_13 = arith.constant 0 : index
    %c0_14 = arith.constant 0 : index
    %40 = vector.load %arg4[%c0_13, %c0_14] : memref<16x1xf32, #tpu.memory_space<vmem>>, vector<16x1xf32>
    %41 = vector.broadcast %40 : vector<16x1xf32> to vector<16x128xf32>
    %42 = arith.mulf %39, %41 : vector<16x128xf32>
    %c0_15 = arith.constant 0 : index
    %c0_16 = arith.constant 0 : index
    %43 = vector.load %arg5[%c0_15, %c0_16] : memref<16x1xf32, #tpu.memory_space<vmem>>, vector<16x1xf32>
    %44 = vector.broadcast %43 : vector<16x1xf32> to vector<16x128xf32>
    %45 = arith.addf %42, %44 : vector<16x128xf32>
    %c0_17 = arith.constant 0 : index
    %c0_18 = arith.constant 0 : index
    %46 = vector.load %arg6[%c0_17, %c0_18] : memref<16x128xf32, #tpu.memory_space<vmem>>, vector<16x128xf32>
    tpu.vector_store %arg6[%c0_17, %c0_18], %45 {strides = array<i32>} : memref<16x128xf32, #tpu.memory_space<vmem>>, vector<16x128xf32>,
    return
  }
  func.func @transform_0(%arg0: i32) -> (i32, i32) {
    %c0_i32 = arith.constant 0 : i32
    %c0_i32_0 = arith.constant 0 : i32
    %c0_i32_1 = arith.constant 0 : i32
    return %c0_i32, %c0_i32_0 : i32, i32
  }
  func.func @transform_1(%arg0: i32) -> (i32, i32) {
    %c0_i32 = arith.constant 0 : i32
    %c0_i32_0 = arith.constant 0 : i32
    %c0_i32_1 = arith.constant 0 : i32
    return %c0_i32, %c0_i32_0 : i32, i32
  }
  func.func @transform_2(%arg0: i32) -> (i32, i32) {
    %c0_i32 = arith.constant 0 : i32
    %c0_i32_0 = arith.constant 0 : i32
    %c0_i32_1 = arith.constant 0 : i32
    return %c0_i32, %c0_i32_0 : i32, i32
  }
  func.func @transform_3(%arg0: i32) -> (i32, i32) {
    %c0_i32 = arith.constant 0 : i32
    %c0_i32_0 = arith.constant 0 : i32
    %c0_i32_1 = arith.constant 0 : i32
    return %c0_i32, %c0_i32_0 : i32, i32
  }
  func.func @transform_4(%arg0: i32) -> (i32, i32) {
    %c0_i32 = arith.constant 0 : i32
    %c0_i32_0 = arith.constant 0 : i32
    %c0_i32_1 = arith.constant 0 : i32
    return %c0_i32, %c0_i32_0 : i32, i32
  }
  func.func @transform_5(%arg0: i32) -> (i32, i32) {
    %c0_i32 = arith.constant 0 : i32
    %c0_i32_0 = arith.constant 0 : i32
    %c0_i32_1 = arith.constant 0 : i32
    return %c0_i32, %c0_i32_0 : i32, i32
  }
}

module attributes {stable_mosaic.version = 11 : i64} {
  func.func @_fc_stack_kernel(%arg0: i32, %arg1: memref<2x400xf32, #tpu.memory_space<vmem>>, %arg2: memref<400x120xf32, #tpu.memory_space<vmem>>, %arg3: memref<1x120xf32, #tpu.memory_space<vmem>>, %arg4: memref<120x84xf32, #tpu.memory_space<vmem>>, %arg5: memref<1x84xf32, #tpu.memory_space<vmem>>, %arg6: memref<84x128xf32, #tpu.memory_space<vmem>>, %arg7: memref<1x128xf32, #tpu.memory_space<vmem>>, %arg8: memref<2x128xf32, #tpu.memory_space<vmem>>) attributes {dimension_semantics = [#tpu.dimension_semantics<parallel>], iteration_bounds = array<i64: 1>, scalar_prefetch = 0 : i64, scratch_operands = 0 : i64, tpu.core_type = #tpu.core_type<tc>, window_params = [{transform_indices = @transform_0, window_bounds = array<i64: 2, 400>}, {pipeline_mode = #tpu.pipeline_mode<synchronous>, transform_indices = @transform_1, window_bounds = array<i64: 400, 120>}, {pipeline_mode = #tpu.pipeline_mode<synchronous>, transform_indices = @transform_2, window_bounds = array<i64: 1, 120>}, {pipeline_mode = #tpu.pipeline_mode<synchronous>, transform_indices = @transform_3, window_bounds = array<i64: 120, 84>}, {pipeline_mode = #tpu.pipeline_mode<synchronous>, transform_indices = @transform_4, window_bounds = array<i64: 1, 84>}, {pipeline_mode = #tpu.pipeline_mode<synchronous>, transform_indices = @transform_5, window_bounds = array<i64: 84, 128>}, {pipeline_mode = #tpu.pipeline_mode<synchronous>, transform_indices = @transform_6, window_bounds = array<i64: 1, 128>}, {transform_indices = @transform_7, window_bounds = array<i64: 2, 128>}]} {
    %c0 = arith.constant 0 : index
    %c0_0 = arith.constant 0 : index
    %0 = vector.load %arg1[%c0, %c0_0] : memref<2x400xf32, #tpu.memory_space<vmem>>, vector<2x400xf32>
    %c0_1 = arith.constant 0 : index
    %c0_2 = arith.constant 0 : index
    %1 = vector.load %arg2[%c0_1, %c0_2] : memref<400x120xf32, #tpu.memory_space<vmem>>, vector<400x120xf32>
    %cst = arith.constant dense<0.000000e+00> : vector<2x120xf32>
    %2 = tpu.matmul %0, %1, %cst {dimension_numbers = #tpu.dot_dimension_numbers<[1], [0], [0], [1], [0, 0, 1, 1], [], []>} : vector<2x400xf32>, vector<400x120xf32>, vector<2x120xf32> -> vector<2x120xf32>
    %c0_3 = arith.constant 0 : index
    %c0_4 = arith.constant 0 : index
    %3 = vector.load %arg3[%c0_3, %c0_4] : memref<1x120xf32, #tpu.memory_space<vmem>>, vector<1x120xf32>
    %4 = vector.broadcast %3 : vector<1x120xf32> to vector<2x120xf32>
    %5 = arith.addf %2, %4 : vector<2x120xf32>
    %cst_5 = arith.constant 0.000000e+00 : f32
    %6 = vector.broadcast %cst_5 : f32 to vector<2x120xf32>
    %7 = arith.maximumf %5, %6 : vector<2x120xf32>
    %c0_6 = arith.constant 0 : index
    %c0_7 = arith.constant 0 : index
    %8 = vector.load %arg4[%c0_6, %c0_7] : memref<120x84xf32, #tpu.memory_space<vmem>>, vector<120x84xf32>
    %cst_8 = arith.constant dense<0.000000e+00> : vector<2x84xf32>
    %9 = tpu.matmul %7, %8, %cst_8 {dimension_numbers = #tpu.dot_dimension_numbers<[1], [0], [0], [1], [0, 0, 1, 1], [], []>} : vector<2x120xf32>, vector<120x84xf32>, vector<2x84xf32> -> vector<2x84xf32>
    %c0_9 = arith.constant 0 : index
    %c0_10 = arith.constant 0 : index
    %10 = vector.load %arg5[%c0_9, %c0_10] : memref<1x84xf32, #tpu.memory_space<vmem>>, vector<1x84xf32>
    %11 = vector.broadcast %10 : vector<1x84xf32> to vector<2x84xf32>
    %12 = arith.addf %9, %11 : vector<2x84xf32>
    %cst_11 = arith.constant 0.000000e+00 : f32
    %13 = vector.broadcast %cst_11 : f32 to vector<2x84xf32>
    %14 = arith.maximumf %12, %13 : vector<2x84xf32>
    %c0_12 = arith.constant 0 : index
    %c0_13 = arith.constant 0 : index
    %15 = vector.load %arg6[%c0_12, %c0_13] : memref<84x128xf32, #tpu.memory_space<vmem>>, vector<84x128xf32>
    %cst_14 = arith.constant dense<0.000000e+00> : vector<2x128xf32>
    %16 = tpu.matmul %14, %15, %cst_14 {dimension_numbers = #tpu.dot_dimension_numbers<[1], [0], [0], [1], [0, 0, 1, 1], [], []>} : vector<2x84xf32>, vector<84x128xf32>, vector<2x128xf32> -> vector<2x128xf32>
    %c0_15 = arith.constant 0 : index
    %c0_16 = arith.constant 0 : index
    %17 = vector.load %arg7[%c0_15, %c0_16] : memref<1x128xf32, #tpu.memory_space<vmem>>, vector<1x128xf32>
    %18 = vector.broadcast %17 : vector<1x128xf32> to vector<2x128xf32>
    %19 = arith.addf %16, %18 : vector<2x128xf32>
    %c0_17 = arith.constant 0 : index
    %c0_18 = arith.constant 0 : index
    %20 = vector.load %arg8[%c0_17, %c0_18] : memref<2x128xf32, #tpu.memory_space<vmem>>, vector<2x128xf32>
    tpu.vector_store %arg8[%c0_17, %c0_18], %19 {strides = array<i32>} : memref<2x128xf32, #tpu.memory_space<vmem>>, vector<2x128xf32>,
    return
  }
  func.func @transform_0(%arg0: i32) -> (i32, i32) {
    %c0_i32 = arith.constant 0 : i32
    %c0_i32_0 = arith.constant 0 : i32
    return %arg0, %c0_i32 : i32, i32
  }
  func.func @transform_1(%arg0: i32) -> (i32, i32) {
    %c0_i32 = arith.constant 0 : i32
    %c0_i32_0 = arith.constant 0 : i32
    %c0_i32_1 = arith.constant 0 : i32
    return %c0_i32, %c0_i32_0 : i32, i32
  }
  func.func @transform_2(%arg0: i32) -> (i32, i32) {
    %c0_i32 = arith.constant 0 : i32
    %c0_i32_0 = arith.constant 0 : i32
    %c0_i32_1 = arith.constant 0 : i32
    return %c0_i32, %c0_i32_0 : i32, i32
  }
  func.func @transform_3(%arg0: i32) -> (i32, i32) {
    %c0_i32 = arith.constant 0 : i32
    %c0_i32_0 = arith.constant 0 : i32
    %c0_i32_1 = arith.constant 0 : i32
    return %c0_i32, %c0_i32_0 : i32, i32
  }
  func.func @transform_4(%arg0: i32) -> (i32, i32) {
    %c0_i32 = arith.constant 0 : i32
    %c0_i32_0 = arith.constant 0 : i32
    %c0_i32_1 = arith.constant 0 : i32
    return %c0_i32, %c0_i32_0 : i32, i32
  }
  func.func @transform_5(%arg0: i32) -> (i32, i32) {
    %c0_i32 = arith.constant 0 : i32
    %c0_i32_0 = arith.constant 0 : i32
    %c0_i32_1 = arith.constant 0 : i32
    return %c0_i32, %c0_i32_0 : i32, i32
  }
  func.func @transform_6(%arg0: i32) -> (i32, i32) {
    %c0_i32 = arith.constant 0 : i32
    %c0_i32_0 = arith.constant 0 : i32
    %c0_i32_1 = arith.constant 0 : i32
    return %c0_i32, %c0_i32_0 : i32, i32
  }
  func.func @transform_7(%arg0: i32) -> (i32, i32) {
    %c0_i32 = arith.constant 0 : i32
    %c0_i32_0 = arith.constant 0 : i32
    return %arg0, %c0_i32 : i32, i32
  }
}

</mosaic_0001>

<bundles_post_ra>
// kernel: lenet_forward.3
= control target key start
LH: loop header
LB: loop body
LE: loop exit
PB: predicated region body
PF: predicated region fallthrough
CT: control target
= control target key end

     0   :  { %s1014_s12 = smov 0   ;;  %s1016_s13 = smov 0   ;;  %s1352_s0 = inlined_call_operand.vmem [shape: f32[75,2048], index: 0, kind: input, shape index: {}]   ;;  %s1353_s1 = inlined_call_operand.vmem [shape: f32[6,75], index: 1, kind: input, shape index: {}]   ;;  %s1354_s2 = inlined_call_operand.vmem [shape: f32[6,1], index: 2, kind: input, shape index: {}]   ;;  %s1355_s3 = inlined_call_operand.vmem [shape: f32[6,512], index: 3, kind: output, shape index: {}]  }
   0x1   :  { %s1018_s14 = smov 0  }
   0x2 LB: > { %s825_s15 = sadd.s32 4294967295, %s989_s14   ;;  %s1031_s16 = sadd.s32 1, %s989_s14   ;;  %s989_s14 = sphi %s1018_s14, %s1360_s14   ;;  %s985_s13 = sphi %s1016_s13, %s1359_s13   ;;  %s981_s12 = sphi %s1014_s12, %s1358_s12  }
   0x3   : > { %s17_s17 = ssub.s32 %s989_s14, %s1031_s16  ;;  %s20_s18 = sadd.s32 1, %s985_s13 }
   0x4   : > { %p18_p0 = scmp.eq.s32.totalorder %s17_s17, 0  ;;  %p27_p1 = scmp.ne.s32.totalorder %s985_s13, %s981_s12 }
   0x5   : > { %p28_p2 = scmp.eq.s32.totalorder %s989_s14, 0  ;;  %p828_p4 = scmp.ge.s32.totalorder %s989_s14, 2 }
   0x6   : > { %s1040_s19 = scalar_select %p18_p0, %s985_s13, %s20_s18  }
   0x7   : > { %p29_p3 = por %p28_p2, %p27_p1  ;;  %127 = sbr.rel (%p828_p4) target bundleno = 59 (0x3b), region = 24 }
   0xe   : > { %130 = sbr.rel (!%p29_p3) target bundleno = 59 (0x3b), region = 28  ;;  %s132_s20 = sand.u32 (%p29_p3), 1, %s985_s13  }
   0xf   : > { %s848_s21 = sshll.u32 (%p29_p3), %s989_s14, 6  ;;  %s937_s22 = smul.u32 (%p29_p3), 640, %s132_s20 }
  0x10   : > { %s1048_s25 = scalar_lea.vmem (%p29_p3), %s1352_s0, %s848_s21 }
  0x11   : > { %v150_v0 = vld [vmem:[%s1048_s25] sm:$0xff] (%p29_p3)  ;;  %v152_v1 = vld [vmem:[%s1048_s25 + $0x8] sm:$0xff] (%p29_p3)  ;;  %v154_v2 = vld [vmem:[%s1048_s25 + $0x10] sm:$0xff] (%p29_p3)  ;;  %s1056_s26 = scalar_lea.vmem (%p29_p3), [#allocation2], %s937_s22 }
  0x12   : > { %v156_v3 = vld [vmem:[%s1048_s25 + $0x18] sm:$0xff] (%p29_p3)  ;;  %v158_v4 = vld [vmem:[%s1048_s25 + $0x20] sm:$0xff] (%p29_p3)  ;;  %v160_v5 = vld [vmem:[%s1048_s25 + $0x28] sm:$0xff] (%p29_p3)  ;;  %151 = vst [vmem:[%s1056_s26] sm:$0xff] (%p29_p3), %v150_v0 }
  0x13   : > { %153 = vst [vmem:[%s1056_s26 + $0x8] sm:$0xff] (%p29_p3), %v152_v1  ;;  %155 = vst [vmem:[%s1056_s26 + $0x10] sm:$0xff] (%p29_p3), %v154_v2  ;;  %v162_v6 = vld [vmem:[%s1048_s25 + $0x30] sm:$0xff] (%p29_p3)  ;;  %v164_v7 = vld [vmem:[%s1048_s25 + $0x38] sm:$0xff] (%p29_p3) }
  0x14   : > { %157 = vst [vmem:[%s1056_s26 + $0x18] sm:$0xff] (%p29_p3), %v156_v3  ;;  %159 = vst [vmem:[%s1056_s26 + $0x20] sm:$0xff] (%p29_p3), %v158_v4  ;;  %v166_v8 = vld [vmem:[%s1048_s25 + $0x80] sm:$0xff] (%p29_p3)  ;;  %v168_v9 = vld [vmem:[%s1048_s25 + $0x88] sm:$0xff] (%p29_p3) }
  0x15   : > { %161 = vst [vmem:[%s1056_s26 + $0x28] sm:$0xff] %v160_v5  ;;  %163 = vst [vmem:[%s1056_s26 + $0x30] sm:$0xff] %v162_v6  ;;  %v170_v10 = vld [vmem:[%s1048_s25 + $0x90] sm:$0xff]  ;;  %v172_v11 = vld [vmem:[%s1048_s25 + $0x98] sm:$0xff] }
  0x16   : > { %165 = vst [vmem:[%s1056_s26 + $0x38] sm:$0xff] %v164_v7  ;;  %167 = vst [vmem:[%s1056_s26 + $0x40] sm:$0xff] %v166_v8  ;;  %v174_v12 = vld [vmem:[%s1048_s25 + $0xa0] sm:$0xff]  ;;  %v176_v13 = vld [vmem:[%s1048_s25 + $0xa8] sm:$0xff] }
  0x17   : > { %169 = vst [vmem:[%s1056_s26 + $0x48] sm:$0xff] %v168_v9  ;;  %171 = vst [vmem:[%s1056_s26 + $0x50] sm:$0xff] %v170_v10  ;;  %v178_v14 = vld [vmem:[%s1048_s25 + $0xb0] sm:$0xff]  ;;  %v180_v15 = vld [vmem:[%s1048_s25 + $0xb8] sm:$0xff] }
  0x18   : > { %173 = vst [vmem:[%s1056_s26 + $0x58] sm:$0xff] %v172_v11  ;;  %175 = vst [vmem:[%s1056_s26 + $0x60] sm:$0xff] %v174_v12  ;;  %v182_v16 = vld [vmem:[%s1048_s25 + $0x100] sm:$0xff]  ;;  %v184_v17 = vld [vmem:[%s1048_s25 + $0x108] sm:$0xff] }
  0x19   : > { %177 = vst [vmem:[%s1056_s26 + $0x68] sm:$0xff] %v176_v13  ;;  %179 = vst [vmem:[%s1056_s26 + $0x70] sm:$0xff] %v178_v14  ;;  %v186_v18 = vld [vmem:[%s1048_s25 + $0x110] sm:$0xff]  ;;  %v188_v19 = vld [vmem:[%s1048_s25 + $0x118] sm:$0xff] }
  0x1a   : > { %181 = vst [vmem:[%s1056_s26 + $0x78] sm:$0xff] %v180_v15  ;;  %183 = vst [vmem:[%s1056_s26 + $0x80] sm:$0xff] %v182_v16  ;;  %v190_v20 = vld [vmem:[%s1048_s25 + $0x120] sm:$0xff]  ;;  %v192_v21 = vld [vmem:[%s1048_s25 + $0x128] sm:$0xff] }
  0x1b   : > { %185 = vst [vmem:[%s1056_s26 + $0x88] sm:$0xff] %v184_v17  ;;  %187 = vst [vmem:[%s1056_s26 + $0x90] sm:$0xff] %v186_v18  ;;  %v194_v22 = vld [vmem:[%s1048_s25 + $0x130] sm:$0xff]  ;;  %v196_v23 = vld [vmem:[%s1048_s25 + $0x138] sm:$0xff] }
  0x1c   : > { %189 = vst [vmem:[%s1056_s26 + $0x98] sm:$0xff] %v188_v19  ;;  %191 = vst [vmem:[%s1056_s26 + $0xa0] sm:$0xff] %v190_v20  ;;  %v198_v24 = vld [vmem:[%s1048_s25 + $0x180] sm:$0xff]  ;;  %v200_v25 = vld [vmem:[%s1048_s25 + $0x188] sm:$0xff] }
  0x1d   : > { %193 = vst [vmem:[%s1056_s26 + $0xa8] sm:$0xff] %v192_v21  ;;  %195 = vst [vmem:[%s1056_s26 + $0xb0] sm:$0xff] %v194_v22  ;;  %v202_v26 = vld [vmem:[%s1048_s25 + $0x190] sm:$0xff]  ;;  %v204_v27 = vld [vmem:[%s1048_s25 + $0x198] sm:$0xff] }
  0x1e   : > { %197 = vst [vmem:[%s1056_s26 + $0xb8] sm:$0xff] %v196_v23  ;;  %199 = vst [vmem:[%s1056_s26 + $0xc0] sm:$0xff] %v198_v24  ;;  %v206_v28 = vld [vmem:[%s1048_s25 + $0x1a0] sm:$0xff]  ;;  %v208_v29 = vld [vmem:[%s1048_s25 + $0x1a8] sm:$0xff] }
  0x1f   : > { %201 = vst [vmem:[%s1056_s26 + $0xc8] sm:$0xff] %v200_v25  ;;  %203 = vst [vmem:[%s1056_s26 + $0xd0] sm:$0xff] %v202_v26  ;;  %v210_v30 = vld [vmem:[%s1048_s25 + $0x1b0] sm:$0xff]  ;;  %v212_v31 = vld [vmem:[%s1048_s25 + $0x1b8] sm:$0xff] }
  0x20   : > { %205 = vst [vmem:[%s1056_s26 + $0xd8] sm:$0xff] %v204_v27  ;;  %207 = vst [vmem:[%s1056_s26 + $0xe0] sm:$0xff] %v206_v28  ;;  %v214_v32 = vld [vmem:[%s1048_s25 + $0x200] sm:$0xff]  ;;  %v216_v33 = vld [vmem:[%s1048_s25 + $0x208] sm:$0xff] }
  0x21   : > { %209 = vst [vmem:[%s1056_s26 + $0xe8] sm:$0xff] %v208_v29  ;;  %211 = vst [vmem:[%s1056_s26 + $0xf0] sm:$0xff] %v210_v30  ;;  %v218_v34 = vld [vmem:[%s1048_s25 + $0x210] sm:$0xff]  ;;  %v220_v35 = vld [vmem:[%s1048_s25 + $0x218] sm:$0xff] }
  0x22   : > { %213 = vst [vmem:[%s1056_s26 + $0xf8] sm:$0xff] %v212_v31  ;;  %215 = vst [vmem:[%s1056_s26 + $0x100] sm:$0xff] %v214_v32  ;;  %v222_v36 = vld [vmem:[%s1048_s25 + $0x220] sm:$0xff]  ;;  %v224_v37 = vld [vmem:[%s1048_s25 + $0x228] sm:$0xff] }
  0x23   : > { %217 = vst [vmem:[%s1056_s26 + $0x108] sm:$0xff] %v216_v33  ;;  %219 = vst [vmem:[%s1056_s26 + $0x110] sm:$0xff] %v218_v34  ;;  %v226_v38 = vld [vmem:[%s1048_s25 + $0x230] sm:$0xff]  ;;  %v228_v39 = vld [vmem:[%s1048_s25 + $0x238] sm:$0xff] }
  0x24   : > { %221 = vst [vmem:[%s1056_s26 + $0x118] sm:$0xff] %v220_v35  ;;  %223 = vst [vmem:[%s1056_s26 + $0x120] sm:$0xff] %v222_v36  ;;  %v230_v40 = vld [vmem:[%s1048_s25 + $0x280] sm:$0xff]  ;;  %v232_v41 = vld [vmem:[%s1048_s25 + $0x288] sm:$0xff] }
  0x25   : > { %225 = vst [vmem:[%s1056_s26 + $0x128] sm:$0xff] %v224_v37  ;;  %227 = vst [vmem:[%s1056_s26 + $0x130] sm:$0xff] %v226_v38  ;;  %v234_v42 = vld [vmem:[%s1048_s25 + $0x290] sm:$0xff]  ;;  %v236_v43 = vld [vmem:[%s1048_s25 + $0x298] sm:$0xff] }
  0x26   : > { %229 = vst [vmem:[%s1056_s26 + $0x138] sm:$0xff] %v228_v39  ;;  %231 = vst [vmem:[%s1056_s26 + $0x140] sm:$0xff] %v230_v40  ;;  %v238_v44 = vld [vmem:[%s1048_s25 + $0x2a0] sm:$0xff]  ;;  %v240_v45 = vld [vmem:[%s1048_s25 + $0x2a8] sm:$0xff] }
  0x27   : > { %233 = vst [vmem:[%s1056_s26 + $0x148] sm:$0xff] %v232_v41  ;;  %235 = vst [vmem:[%s1056_s26 + $0x150] sm:$0xff] %v234_v42  ;;  %v242_v46 = vld [vmem:[%s1048_s25 + $0x2b0] sm:$0xff]  ;;  %v244_v47 = vld [vmem:[%s1048_s25 + $0x2b8] sm:$0xff] }
  0x28   : > { %237 = vst [vmem:[%s1056_s26 + $0x158] sm:$0xff] %v236_v43  ;;  %239 = vst [vmem:[%s1056_s26 + $0x160] sm:$0xff] %v238_v44  ;;  %v246_v48 = vld [vmem:[%s1048_s25 + $0x300] sm:$0xff]  ;;  %v248_v49 = vld [vmem:[%s1048_s25 + $0x308] sm:$0xff] }
  0x29   : > { %241 = vst [vmem:[%s1056_s26 + $0x168] sm:$0xff] %v240_v45  ;;  %243 = vst [vmem:[%s1056_s26 + $0x170] sm:$0xff] %v242_v46  ;;  %v250_v50 = vld [vmem:[%s1048_s25 + $0x310] sm:$0xff]  ;;  %v252_v51 = vld [vmem:[%s1048_s25 + $0x318] sm:$0xff] }
  0x2a   : > { %245 = vst [vmem:[%s1056_s26 + $0x178] sm:$0xff] %v244_v47  ;;  %247 = vst [vmem:[%s1056_s26 + $0x180] sm:$0xff] %v246_v48  ;;  %v254_v52 = vld [vmem:[%s1048_s25 + $0x320] sm:$0xff]  ;;  %v256_v53 = vld [vmem:[%s1048_s25 + $0x328] sm:$0xff] }
  0x2b   : > { %249 = vst [vmem:[%s1056_s26 + $0x188] sm:$0xff] %v248_v49  ;;  %251 = vst [vmem:[%s1056_s26 + $0x190] sm:$0xff] %v250_v50  ;;  %v258_v54 = vld [vmem:[%s1048_s25 + $0x330] sm:$0xff]  ;;  %v260_v55 = vld [vmem:[%s1048_s25 + $0x338] sm:$0xff] }
  0x2c   : > { %253 = vst [vmem:[%s1056_s26 + $0x198] sm:$0xff] %v252_v51  ;;  %255 = vst [vmem:[%s1056_s26 + $0x1a0] sm:$0xff] %v254_v52  ;;  %v262_v56 = vld [vmem:[%s1048_s25 + $0x380] sm:$0xff]  ;;  %v264_v57 = vld [vmem:[%s1048_s25 + $0x388] sm:$0xff] }
  0x2d   : > { %257 = vst [vmem:[%s1056_s26 + $0x1a8] sm:$0xff] %v256_v53  ;;  %259 = vst [vmem:[%s1056_s26 + $0x1b0] sm:$0xff] %v258_v54  ;;  %v266_v58 = vld [vmem:[%s1048_s25 + $0x390] sm:$0xff]  ;;  %v268_v59 = vld [vmem:[%s1048_s25 + $0x398] sm:$0xff] }
  0x2e   : > { %261 = vst [vmem:[%s1056_s26 + $0x1b8] sm:$0xff] %v260_v55  ;;  %263 = vst [vmem:[%s1056_s26 + $0x1c0] sm:$0xff] %v262_v56  ;;  %v270_v60 = vld [vmem:[%s1048_s25 + $0x3a0] sm:$0xff]  ;;  %v272_v61 = vld [vmem:[%s1048_s25 + $0x3a8] sm:$0xff] }
  0x2f   : > { %265 = vst [vmem:[%s1056_s26 + $0x1c8] sm:$0xff] %v264_v57  ;;  %267 = vst [vmem:[%s1056_s26 + $0x1d0] sm:$0xff] %v266_v58  ;;  %v274_v62 = vld [vmem:[%s1048_s25 + $0x3b0] sm:$0xff]  ;;  %v276_v63 = vld [vmem:[%s1048_s25 + $0x3b8] sm:$0xff] }
  0x30   : > { %269 = vst [vmem:[%s1056_s26 + $0x1d8] sm:$0xff] %v268_v59  ;;  %271 = vst [vmem:[%s1056_s26 + $0x1e0] sm:$0xff] %v270_v60  ;;  %v278_v0 = vld [vmem:[%s1048_s25 + $0x400] sm:$0xff]  ;;  %v280_v1 = vld [vmem:[%s1048_s25 + $0x408] sm:$0xff] }
  0x31   : > { %273 = vst [vmem:[%s1056_s26 + $0x1e8] sm:$0xff] %v272_v61  ;;  %275 = vst [vmem:[%s1056_s26 + $0x1f0] sm:$0xff] %v274_v62  ;;  %v282_v2 = vld [vmem:[%s1048_s25 + $0x410] sm:$0xff]  ;;  %v284_v3 = vld [vmem:[%s1048_s25 + $0x418] sm:$0xff] }
  0x32   : > { %277 = vst [vmem:[%s1056_s26 + $0x1f8] sm:$0xff] %v276_v63  ;;  %279 = vst [vmem:[%s1056_s26 + $0x200] sm:$0xff] %v278_v0  ;;  %v286_v4 = vld [vmem:[%s1048_s25 + $0x420] sm:$0xff]  ;;  %v288_v5 = vld [vmem:[%s1048_s25 + $0x428] sm:$0xff] }
  0x33   : > { %281 = vst [vmem:[%s1056_s26 + $0x208] sm:$0xff] %v280_v1  ;;  %283 = vst [vmem:[%s1056_s26 + $0x210] sm:$0xff] %v282_v2  ;;  %v290_v6 = vld [vmem:[%s1048_s25 + $0x430] sm:$0xff]  ;;  %v292_v7 = vld [vmem:[%s1048_s25 + $0x438] sm:$0xff] }
  0x34   : > { %285 = vst [vmem:[%s1056_s26 + $0x218] sm:$0xff] %v284_v3  ;;  %287 = vst [vmem:[%s1056_s26 + $0x220] sm:$0xff] %v286_v4  ;;  %v294_v8 = vld [vmem:[%s1048_s25 + $0x480] sm:$0xff]  ;;  %v296_v9 = vld [vmem:[%s1048_s25 + $0x488] sm:$0xff] }
  0x35   : > { %289 = vst [vmem:[%s1056_s26 + $0x228] sm:$0xff] %v288_v5  ;;  %291 = vst [vmem:[%s1056_s26 + $0x230] sm:$0xff] %v290_v6  ;;  %v298_v10 = vld [vmem:[%s1048_s25 + $0x490] sm:$0xff]  ;;  %v300_v11 = vld [vmem:[%s1048_s25 + $0x498] sm:$0xff] }
  0x36   : > { %293 = vst [vmem:[%s1056_s26 + $0x238] sm:$0xff] %v292_v7  ;;  %295 = vst [vmem:[%s1056_s26 + $0x240] sm:$0xff] %v294_v8  ;;  %v302_v12 = vld [vmem:[%s1048_s25 + $0x4a0] sm:$0xff]  ;;  %v304_v13 = vld [vmem:[%s1048_s25 + $0x4a8] sm:$0xff] }
  0x37   : > { %297 = vst [vmem:[%s1056_s26 + $0x248] sm:$0xff] %v296_v9  ;;  %299 = vst [vmem:[%s1056_s26 + $0x250] sm:$0xff] %v298_v10  ;;  %v306_v14 = vld [vmem:[%s1048_s25 + $0x4b0] sm:$0xff]  ;;  %v308_v15 = vld [vmem:[%s1048_s25 + $0x4b8] sm:$0xff] }
  0x38   : > { %301 = vst [vmem:[%s1056_s26 + $0x258] sm:$0xff] %v300_v11  ;;  %303 = vst [vmem:[%s1056_s26 + $0x260] sm:$0xff] %v302_v12 }
  0x39   : > { %305 = vst [vmem:[%s1056_s26 + $0x268] sm:$0xff] %v304_v13  ;;  %307 = vst [vmem:[%s1056_s26 + $0x270] sm:$0xff] %v306_v14 }
  0x3a   : > { %309 = vst [vmem:[%s1056_s26 + $0x278] sm:$0xff] %v308_v15 }
  0x3b PF: > { %p831_p5 = scmp.ge.s32.totalorder %s989_s14, 1  ;;  %p314_p6 = scmp.lt.s32.totalorder %s989_s14, 3 }
  0x3d   : > { %p315_p7 = pnand %p831_p5, %p314_p6 }
  0x3e   : > { %s321_s27 = sand.u32 (!%p315_p7), 1, %s981_s12   ;;  %v991_v16 = vmov (!%p315_p7), 0.0   ;;  %v751_v17 = vld [vmem:[%s1354_s2] sm:$0x3f] (!%p315_p7)  ;;  %v992_v18 = vmov (!%p315_p7), 0   ;;  %vm436_vm0 = vcmask (!%p315_p7), 1042432  }
  0x3f   : > { %318 = sbr.rel (%p315_p7) target bundleno = 334 (0x14e), region = 51  ;;  %525 = vmatprep.mubr.f32.mxu0 (!%p315_p7), %v991_v16  ;;  %596 = vmatprep.mubr.f32.mxu1 (!%p315_p7), %v991_v16  ;;  %vm993_vm1 = vmmov (!%p315_p7), 1   ;;  %vm432_vm3 = vcmask (!%p315_p7), 613376   ;;  %s832_s7 = sshll.u32 (!%p315_p7), %s825_s15, 1 }
  0x40   : > { %s938_s28 = smul.u32 (!%p315_p7), 640, %s321_s27  ;;  %966 = vset.pattern.permute.xlu0 (!%p315_p7), %v992_v18  ;;  %vm1258_vm2 = vmpackc.low (!%p315_p7), %vm436_vm0, %vm993_vm1  ;;  %p346_p8 = scmp.lt.s32.totalorder (!%p315_p7), %s832_s7, 3 }
  0x41   : > { %754 = vperm.xlu0 (!%p315_p7), %966, %v751_v17  }
  0x42   : > { %s1220_s4 = scalar_lea.vmem (!%p315_p7), [#allocation2], %s938_s28 }
  0x43   : > { %v353_v19 = vld [vmem:[%s1220_s4 + $0x8] sm:$0xff] (!%p315_p7)  ;;  %v355_v21 = vld [vmem:[%s1220_s4 + $0x18] sm:$0xff] (!%p315_p7)  ;;  %v352_v24 = vld [vmem:[%s1220_s4] sm:$0xff] (!%p315_p7) }
  0x44   : > { %v361_v20 = vld [vmem:[%s1220_s4 + $0x48] sm:$0xff] (!%p315_p7)  ;;  %v363_v23 = vld [vmem:[%s1220_s4 + $0x58] sm:$0xff] (!%p315_p7)  ;;  %v360_v25 = vld [vmem:[%s1220_s4 + $0x40] sm:$0xff] (!%p315_p7) }
  0x45   : > { %v849_v22 = vpack.c.bf16 (!%p315_p7), %v361_v20, %v353_v19  ;;  %v871_v26 = vpack.c.bf16 (!%p315_p7), %v363_v23, %v355_v21  ;;  %v851_v27 = vpack.c.bf16 (!%p315_p7), %v360_v25, %v352_v24  ;;  %v354_v28 = vld [vmem:[%s1220_s4 + $0x10] sm:$0xff] (!%p315_p7)  ;;  %v369_v30 = vld [vmem:[%s1220_s4 + $0x88] sm:$0xff] (!%p315_p7)  ;;  %v371_v33 = vld [vmem:[%s1220_s4 + $0x98] sm:$0xff] (!%p315_p7) }
  0x46   : > { %v362_v29 = vld [vmem:[%s1220_s4 + $0x50] sm:$0xff]  ;;  %v377_v32 = vld [vmem:[%s1220_s4 + $0xc8] sm:$0xff]  ;;  %v379_v34 = vld [vmem:[%s1220_s4 + $0xd8] sm:$0xff]  ;;  %s1362_s7 = smov (!%p346_p8, %s832_s7), 3 }
  0x47   : > { %850 = vmatprep.subr.bf16.mxu0 %v849_v22  ;;  %v873_v31 = vpack.c.bf16 %v362_v29, %v354_v28  ;;  %872 = vmatprep.subr.bf16.mxu1 %v871_v26  ;;  %v853_v35 = vpack.c.bf16 %v377_v32, %v369_v30  ;;  %v875_v36 = vpack.c.bf16 %v379_v34, %v371_v33  ;;  %v368_v37 = vld [vmem:[%s1220_s4 + $0x80] sm:$0xff]  ;;  %v370_v39 = vld [vmem:[%s1220_s4 + $0x90] sm:$0xff]  ;;  %v385_v42 = vld [vmem:[%s1220_s4 + $0x108] sm:$0xff]  ;;  %s833_s8 = sshll.u32 %s1362_s7, 3 }
  0x48   : > { %852 = vmatpush1.bf16.msra.mxu0 %v851_v27  ;;  %v376_v38 = vld [vmem:[%s1220_s4 + $0xc0] sm:$0xff]  ;;  %v378_v41 = vld [vmem:[%s1220_s4 + $0xd0] sm:$0xff]  ;;  %v393_v43 = vld [vmem:[%s1220_s4 + $0x148] sm:$0xff]  ;;  %s349_s11 = scalar_lea.vmem %s1355_s3, %s833_s8 }
  0x49   : > { %874 = vmatpush1.bf16.msra.mxu1 %v873_v31  ;;  %v855_v40 = vpack.c.bf16 %v376_v38, %v368_v37  ;;  %854 = vmatprep.subr.bf16.mxu0 %v853_v35  ;;  %v877_v44 = vpack.c.bf16 %v378_v41, %v370_v39  ;;  %v857_v45 = vpack.c.bf16 %v393_v43, %v385_v42  ;;  %v387_v46 = vld [vmem:[%s1220_s4 + $0x118] sm:$0xff]  ;;  %v384_v48 = vld [vmem:[%s1220_s4 + $0x100] sm:$0xff]  ;;  %v386_v51 = vld [vmem:[%s1220_s4 + $0x110] sm:$0xff] }
  0x4a   : > { %876 = vmatprep.subr.bf16.mxu1 %v875_v36  ;;  %v395_v47 = vld [vmem:[%s1220_s4 + $0x158] sm:$0xff]  ;;  %v392_v50 = vld [vmem:[%s1220_s4 + $0x140] sm:$0xff]  ;;  %v394_v52 = vld [vmem:[%s1220_s4 + $0x150] sm:$0xff] }
  0x4b   : > { %v879_v49 = vpack.c.bf16 %v395_v47, %v387_v46  ;;  %v859_v53 = vpack.c.bf16 %v392_v50, %v384_v48  ;;  %v401_v54 = vld [vmem:[%s1220_s4 + $0x188] sm:$0xff]  ;;  %v403_v56 = vld [vmem:[%s1220_s4 + $0x198] sm:$0xff]  ;;  %v881_v57 = vpack.c.bf16 %v394_v52, %v386_v51  ;;  %v400_v60 = vld [vmem:[%s1220_s4 + $0x180] sm:$0xff] }
  0x4c   : > { %856 = vmatpush1.bf16.msra.mxu0 %v855_v40  ;;  %v409_v55 = vld [vmem:[%s1220_s4 + $0x1c8] sm:$0xff]  ;;  %v411_v59 = vld [vmem:[%s1220_s4 + $0x1d8] sm:$0xff]  ;;  %v408_v61 = vld [vmem:[%s1220_s4 + $0x1c0] sm:$0xff] }
  0x4d   : > { %878 = vmatpush1.bf16.msra.mxu1 %v877_v44  ;;  %858 = vmatprep.subr.bf16.mxu0 %v857_v45  ;;  %v861_v58 = vpack.c.bf16 %v409_v55, %v401_v54  ;;  %v883_v62 = vpack.c.bf16 %v411_v59, %v403_v56  ;;  %v402_v63 = vld [vmem:[%s1220_s4 + $0x190] sm:$0xff]  ;;  %v417_v1 = vld [vmem:[%s1220_s4 + $0x208] sm:$0xff]  ;;  %v419_v3 = vld [vmem:[%s1220_s4 + $0x218] sm:$0xff]  ;;  %v863_v5 = vpack.c.bf16 %v408_v61, %v400_v60 }
  0x4e   : > { %880 = vmatprep.subr.bf16.mxu1 %v879_v49  ;;  %v410_v0 = vld [vmem:[%s1220_s4 + $0x1d0] sm:$0xff]  ;;  %v425_v2 = vld [vmem:[%s1220_s4 + $0x248] sm:$0x7]  ;;  %v427_v4 = vld [vmem:[%s1220_s4 + $0x258] sm:$0x7] }
  0x4f   : > { %v885_v7 = vpack.c.bf16 %v410_v0, %v402_v63  ;;  %v865_v8 = vpack.c.bf16 %v425_v2, %v417_v1  ;;  %v416_v9 = vld [vmem:[%s1220_s4 + $0x200] sm:$0xff]  ;;  %v418_v11 = vld [vmem:[%s1220_s4 + $0x210] sm:$0xff]  ;;  %v887_v12 = vpack.c.bf16 %v427_v4, %v419_v3  ;;  %v357_v14 = vld [vmem:[%s1220_s4 + $0x28] sm:$0xff] }
  0x50   : > { %860 = vmatpush1.bf16.msra.mxu0 %v859_v53  ;;  %v424_v10 = vld [vmem:[%s1220_s4 + $0x240] sm:$0x7]  ;;  %v426_v13 = vld [vmem:[%s1220_s4 + $0x250] sm:$0x7]  ;;  %v365_v15 = vld [vmem:[%s1220_s4 + $0x68] sm:$0xff] }
  0x51   : > { %882 = vmatpush1.bf16.msra.mxu1 %v881_v57  ;;  %862 = vmatprep.subr.bf16.mxu0 %v861_v58  ;;  %v359_v17 = vld [vmem:[%s1220_s4 + $0x38] sm:$0xff]  ;;  %v868_v19 = vpack.c.bf16 %v424_v10, %v416_v9  ;;  %v890_v20 = vpack.c.bf16 %v426_v13, %v418_v11  ;;  %v893_v21 = vpack.c.bf16 %v365_v15, %v357_v14  ;;  %v356_v22 = vld [vmem:[%s1220_s4 + $0x20] sm:$0xff]  ;;  %v358_v24 = vld [vmem:[%s1220_s4 + $0x30] sm:$0xff] }
  0x52   : > { %884 = vmatprep.subr.bf16.mxu1 %v883_v62  ;;  %v367_v18 = vld [vmem:[%s1220_s4 + $0x78] sm:$0xff]  ;;  %v364_v23 = vld [vmem:[%s1220_s4 + $0x60] sm:$0xff]  ;;  %v366_v26 = vld [vmem:[%s1220_s4 + $0x70] sm:$0xff] }
  0x53   : > { %v915_v25 = vpack.c.bf16 %v367_v18, %v359_v17  ;;  %v373_v27 = vld [vmem:[%s1220_s4 + $0xa8] sm:$0xff]  ;;  %v375_v29 = vld [vmem:[%s1220_s4 + $0xb8] sm:$0xff]  ;;  %v1287_v31 = vld [vmem:[%s1353_s1] sm:$0x3f]  ;;  %v895_v32 = vpack.c.bf16 %v364_v23, %v356_v22  ;;  %v917_v33 = vpack.c.bf16 %v366_v26, %v358_v24 }
  0x54   : > { %864 = vmatpush1.bf16.msra.mxu0 %v863_v5  ;;  %v381_v28 = vld [vmem:[%s1220_s4 + $0xe8] sm:$0xff]  ;;  %v383_v30 = vld [vmem:[%s1220_s4 + $0xf8] sm:$0xff]  ;;  %v372_v35 = vld [vmem:[%s1220_s4 + $0xa0] sm:$0xff] }
  0x55   : > { %886 = vmatpush1.bf16.msra.mxu1 %v885_v7  ;;  %867 = vmatprep.subr.msk.bf16.mxu0 %vm1258_vm2, %v865_v8  ;;  %v897_v34 = vpack.c.bf16 %v381_v28, %v373_v27  ;;  %v380_v36 = vld [vmem:[%s1220_s4 + $0xe0] sm:$0xff]  ;;  %v374_v37 = vld [vmem:[%s1220_s4 + $0xb0] sm:$0xff]  ;;  %v919_v38 = vpack.c.bf16 %v383_v30, %v375_v29  ;;  %v389_v40 = vld [vmem:[%s1220_s4 + $0x128] sm:$0xff] }
  0x56   : > { %889 = vmatprep.subr.msk.bf16.mxu1 %vm1258_vm2, %v887_v12  ;;  %v382_v39 = vld [vmem:[%s1220_s4 + $0xf0] sm:$0xff]  ;;  %v397_v41 = vld [vmem:[%s1220_s4 + $0x168] sm:$0xff]  ;;  %v391_v42 = vld [vmem:[%s1220_s4 + $0x138] sm:$0xff]  ;;  %v899_v44 = vpack.c.bf16 %v380_v36, %v372_v35 }
  0x57   : > { %v399_v43 = vld [vmem:[%s1220_s4 + $0x178] sm:$0xff]  ;;  %v921_v45 = vpack.c.bf16 %v382_v39, %v374_v37  ;;  %v901_v46 = vpack.c.bf16 %v397_v41, %v389_v40  ;;  %v388_v47 = vld [vmem:[%s1220_s4 + $0x120] sm:$0xff]  ;;  %v390_v49 = vld [vmem:[%s1220_s4 + $0x130] sm:$0xff] }
  0x58   : > { %870 = vmatpush1.bf16.msk.msra.mxu0 %vm1258_vm2, %v868_v19  ;;  %v396_v48 = vld [vmem:[%s1220_s4 + $0x160] sm:$0xff]  ;;  %v923_v50 = vpack.c.bf16 %v399_v43, %v391_v42  ;;  %v398_v51 = vld [vmem:[%s1220_s4 + $0x170] sm:$0xff]  ;;  %v405_v52 = vld [vmem:[%s1220_s4 + $0x1a8] sm:$0xff] }
  0x59   : > { %892 = vmatpush1.bf16.msk.msra.mxu1 %vm1258_vm2, %v890_v20  ;;  %894 = vmatprep.subr.bf16.mxu0 %v893_v21  ;;  %v413_v53 = vld [vmem:[%s1220_s4 + $0x1e8] sm:$0xff]  ;;  %v407_v54 = vld [vmem:[%s1220_s4 + $0x1b8] sm:$0xff]  ;;  %v903_v56 = vpack.c.bf16 %v396_v48, %v388_v47  ;;  %v925_v57 = vpack.c.bf16 %v398_v51, %v390_v49  ;;  %v404_v59 = vld [vmem:[%s1220_s4 + $0x1a0] sm:$0xff] }
  0x5a   : > { %916 = vmatprep.subr.bf16.mxu1 %v915_v25  ;;  %v415_v55 = vld [vmem:[%s1220_s4 + $0x1f8] sm:$0xff]  ;;  %v905_v58 = vpack.c.bf16 %v413_v53, %v405_v52  ;;  %v412_v60 = vld [vmem:[%s1220_s4 + $0x1e0] sm:$0xff]  ;;  %v406_v61 = vld [vmem:[%s1220_s4 + $0x1b0] sm:$0xff] }
  0x5b   : > { %836 = vmatmul.mubr.msk.f32.vlgmr.msra.gmra.mrb[0].mxu0 %vm432_vm3, %v1287_v31  ;;  %v927_v62 = vpack.c.bf16 %v415_v55, %v407_v54  ;;  %v414_v63 = vld [vmem:[%s1220_s4 + $0x1f0] sm:$0xff]  ;;  %v421_v0 = vld [vmem:[%s1220_s4 + $0x228] sm:$0xff]  ;;  %v431_v2 = vld [vmem:[%s1220_s4 + $0x278] sm:$0x7]  ;;  %v907_v3 = vpack.c.bf16 %v412_v60, %v404_v59 }
  0x5c   : > { %839 = vmatmul.mubr.msk.f32.vlgmr.msra.gmra.mrb[0].mxu1 %vm432_vm3, %v1287_v31  ;;  %896 = vmatpush1.bf16.msra.mxu0 %v895_v32  ;;  %v429_v1 = vld [vmem:[%s1220_s4 + $0x268] sm:$0x7]  ;;  %v929_v4 = vpack.c.bf16 %v414_v63, %v406_v61  ;;  %v420_v7 = vld [vmem:[%s1220_s4 + $0x220] sm:$0xff]  ;;  %v422_v10 = vld [vmem:[%s1220_s4 + $0x230] sm:$0xff] }
  0x5d   : > { %918 = vmatpush1.bf16.msra.mxu1 %v917_v33  ;;  %898 = vmatprep.subr.bf16.mxu0 %v897_v34  ;;  %v909_v5 = vpack.c.bf16 %v429_v1, %v421_v0  ;;  %v428_v8 = vld [vmem:[%s1220_s4 + $0x260] sm:$0x7]  ;;  %v430_v11 = vld [vmem:[%s1220_s4 + $0x270] sm:$0x7] }
  0x5e   : > { %920 = vmatprep.subr.bf16.mxu1 %v919_v38  ;;  %667 = vmatprep.mubr.f32.mxu0 %v991_v16  ;;  %v912_v12 = vpack.c.bf16 %v428_v8, %v420_v7  ;;  %v934_v13 = vpack.c.bf16 %v430_v11, %v422_v10 }
  0x5f   : > { %738 = vmatprep.mubr.f32.mxu1 %v991_v16  ;;  %v423_v16 = vld [vmem:[%s1220_s4 + $0x238] sm:$0xff] }
  0x60   : > { %900 = vmatpush1.bf16.msra.mxu0 %v899_v44  ;;  %v931_v9 = vpack.c.bf16 %v431_v2, %v423_v16 }
  0x61   : > { %922 = vmatpush1.bf16.msra.mxu1 %v921_v45  ;;  %902 = vmatprep.subr.bf16.mxu0 %v901_v46 }
  0x62   : > { %924 = vmatprep.subr.bf16.mxu1 %v923_v50 }
  0x64   : > { %904 = vmatpush1.bf16.msra.mxu0 %v903_v56 }
  0x65   : > { %926 = vmatpush1.bf16.msra.mxu1 %v925_v57  ;;  %906 = vmatprep.subr.bf16.mxu0 %v905_v58 }
  0x66   : > { %928 = vmatprep.subr.bf16.mxu1 %v927_v62 }
  0x68   : > { %908 = vmatpush1.bf16.msra.mxu0 %v907_v3 }
  0x69   : > { %930 = vmatpush1.bf16.msra.mxu1 %v929_v4  ;;  %911 = vmatprep.subr.msk.bf16.mxu0 %vm1258_vm2, %v909_v5 }
  0x6a   : > { %933 = vmatprep.subr.msk.bf16.mxu1 %vm1258_vm2, %v931_v9 }
  0x6c   : > { %914 = vmatpush1.bf16.msk.msra.mxu0 %vm1258_vm2, %v912_v12 }
  0x6d   : > { %936 = vmatpush1.bf16.msk.msra.mxu1 %vm1258_vm2, %v934_v13 }
  0x6f   : > { %842 = vmatmul.mubr.msk.f32.vlgmr.msra.gmra.mrb[2].mxu0 %vm432_vm3, %v1287_v31 }
  0x70   : > { %845 = vmatmul.mubr.msk.f32.vlgmr.msra.gmra.mrb[2].mxu1 %vm432_vm3, %v1287_v31 }
  0xc0   : > { %v755_v26 = vpop.permute.xlu0 %754 }
 0x12e   : > { %v527_v14 = vpop.f32.mrb[0].mxu0 }
 0x12f   : > { %v598_v15 = vpop.f32.mrb[0].mxu1  ;;  %v529_v17 = vpop.f32.mrb[1].mxu0 }
 0x130   : > { %v745_v18 = vmax.f32 %v527_v14, %v598_v15  ;;  %v600_v19 = vpop.f32.mrb[1].mxu1 }
 0x131   : > { %v746_v20 = vmax.f32 %v529_v17, %v600_v19 }
 0x142   : > { %v669_v21 = vpop.f32.mrb[2].mxu0 }
 0x143   : > { %v740_v22 = vpop.f32.mrb[2].mxu1  ;;  %v671_v6 = vpop.f32.mrb[3].mxu0 }
 0x144   : > { %v747_v23 = vmax.f32 %v669_v21, %v740_v22  ;;  %v742_v24 = vpop.f32.mrb[3].mxu1 }
 0x145   : > { %v748_v25 = vmax.f32 %v671_v6, %v742_v24 }
 0x146   : > { %v749_v27 = vmax.f32 %v745_v18, %v747_v23 }
 0x147   : > { %v750_v28 = vmax.f32 %v746_v20, %v748_v25 }
 0x148   : > { %v757_v29 = vadd.f32 %v755_v26, %v749_v27 }
 0x149   : > { %v758_v30 = vadd.f32 %v755_v26, %v750_v28 }
 0x14a   : > { %v759_v31 = vmax.f32 %v757_v29, 0.0 }
 0x14b   : > { %v760_v32 = vmax.f32 %v758_v30, 0.0 }
 0x14c   : > { %761 = vst [vmem:[%s349_s11] sm:$0x3f] %v759_v31 }
 0x14d   : > { %762 = vst [vmem:[%s349_s11 + $0x8] sm:$0x3f] %v760_v32 }
 0x14e PF: > { %p10_p9 = scmp.ge.s32.totalorder %s1031_s16, 4   ;;  %s1358_s12 = smov %s985_s13 }
 0x14f   : > { %s1359_s13 = smov %s1040_s19  ;;  %s1360_s14 = smov %s1031_s16 }
 0x150   :  { %12 = sbr.rel (!%p10_p9) target bundleno = 2 (0x2), region = 90 }

// kernel: lenet_forward.4
= control target key start
LH: loop header
LB: loop body
LE: loop exit
PB: predicated region body
PF: predicated region fallthrough
CT: control target
= control target key end

     0   :  { %v447_v3 = vmov 0   ;;  %vm100_vm0 = vcmask 179200   ;;  %vm107_vm1 = vcmask 1045504   ;;  %s750_s0 = inlined_call_operand.vmem [shape: f32[150,512], index: 0, kind: input, shape index: {}]   ;;  %s751_s1 = inlined_call_operand.vmem [shape: f32[16,150], index: 1, kind: input, shape index: {}]   ;;  %s752_s2 = inlined_call_operand.vmem [shape: f32[16,1], index: 2, kind: input, shape index: {}]   ;;  %s753_s3 = inlined_call_operand.vmem [shape: f32[16,1], index: 3, kind: input, shape index: {}]   ;;  %s754_s4 = inlined_call_operand.vmem [shape: f32[16,1], index: 4, kind: input, shape index: {}]   ;;  %s755_s5 = inlined_call_operand.vmem [shape: f32[16,128], index: 5, kind: output, shape index: {}]  }
   0x1   :  { %v25_v0 = vld [vmem:[%s750_s0 + $0x8] sm:$0xff]  ;;  %v27_v2 = vld [vmem:[%s750_s0 + $0x18] sm:$0xff]  ;;  %441 = vset.pattern.permute.xlu0 %v447_v3  ;;  %442 = vset.pattern.permute.xlu1 %v447_v3  ;;  %v24_v6 = vld [vmem:[%s750_s0] sm:$0xff] }
   0x2   :  { %v29_v1 = vld [vmem:[%s750_s0 + $0x28] sm:$0xff]  ;;  %v31_v5 = vld [vmem:[%s750_s0 + $0x38] sm:$0xff]  ;;  %v28_v7 = vld [vmem:[%s750_s0 + $0x20] sm:$0xff] }
   0x3   :  { %v368_v4 = vpack.c.bf16 %v29_v1, %v25_v0  ;;  %v404_v8 = vpack.c.bf16 %v31_v5, %v27_v2  ;;  %v370_v9 = vpack.c.bf16 %v28_v7, %v24_v6  ;;  %v26_v10 = vld [vmem:[%s750_s0 + $0x10] sm:$0xff]  ;;  %v33_v12 = vld [vmem:[%s750_s0 + $0x48] sm:$0xff]  ;;  %v35_v15 = vld [vmem:[%s750_s0 + $0x58] sm:$0xff] }
   0x4   :  { %v30_v11 = vld [vmem:[%s750_s0 + $0x30] sm:$0xff]  ;;  %v37_v14 = vld [vmem:[%s750_s0 + $0x68] sm:$0xff]  ;;  %v39_v16 = vld [vmem:[%s750_s0 + $0x78] sm:$0xff] }
   0x5   :  { %369 = vmatprep.subr.bf16.mxu0 %v368_v4  ;;  %v406_v13 = vpack.c.bf16 %v30_v11, %v26_v10  ;;  %405 = vmatprep.subr.bf16.mxu1 %v404_v8  ;;  %v372_v17 = vpack.c.bf16 %v37_v14, %v33_v12  ;;  %v408_v18 = vpack.c.bf16 %v39_v16, %v35_v15  ;;  %v32_v19 = vld [vmem:[%s750_s0 + $0x40] sm:$0xff]  ;;  %v34_v21 = vld [vmem:[%s750_s0 + $0x50] sm:$0xff]  ;;  %v41_v24 = vld [vmem:[%s750_s0 + $0x88] sm:$0xff] }
   0x6   :  { %371 = vmatpush1.bf16.msra.mxu0 %v370_v9  ;;  %v36_v20 = vld [vmem:[%s750_s0 + $0x60] sm:$0xff]  ;;  %v38_v23 = vld [vmem:[%s750_s0 + $0x70] sm:$0xff]  ;;  %v45_v25 = vld [vmem:[%s750_s0 + $0xa8] sm:$0xff] }
   0x7   :  { %407 = vmatpush1.bf16.msra.mxu1 %v406_v13  ;;  %v374_v22 = vpack.c.bf16 %v36_v20, %v32_v19  ;;  %373 = vmatprep.subr.bf16.mxu0 %v372_v17  ;;  %v410_v26 = vpack.c.bf16 %v38_v23, %v34_v21  ;;  %v376_v27 = vpack.c.bf16 %v45_v25, %v41_v24  ;;  %v43_v28 = vld [vmem:[%s750_s0 + $0x98] sm:$0xff]  ;;  %v40_v30 = vld [vmem:[%s750_s0 + $0x80] sm:$0xff]  ;;  %v42_v33 = vld [vmem:[%s750_s0 + $0x90] sm:$0xff] }
   0x8   :  { %409 = vmatprep.subr.bf16.mxu1 %v408_v18  ;;  %v47_v29 = vld [vmem:[%s750_s0 + $0xb8] sm:$0xff]  ;;  %v44_v32 = vld [vmem:[%s750_s0 + $0xa0] sm:$0xff]  ;;  %v46_v34 = vld [vmem:[%s750_s0 + $0xb0] sm:$0xff] }
   0x9   :  { %v412_v31 = vpack.c.bf16 %v47_v29, %v43_v28  ;;  %v378_v35 = vpack.c.bf16 %v44_v32, %v40_v30  ;;  %v49_v36 = vld [vmem:[%s750_s0 + $0xc8] sm:$0xff]  ;;  %v51_v38 = vld [vmem:[%s750_s0 + $0xd8] sm:$0xff]  ;;  %v414_v39 = vpack.c.bf16 %v46_v34, %v42_v33  ;;  %v48_v42 = vld [vmem:[%s750_s0 + $0xc0] sm:$0xff] }
   0xa   :  { %375 = vmatpush1.bf16.msra.mxu0 %v374_v22  ;;  %v53_v37 = vld [vmem:[%s750_s0 + $0xe8] sm:$0xff]  ;;  %v55_v41 = vld [vmem:[%s750_s0 + $0xf8] sm:$0xff]  ;;  %v52_v43 = vld [vmem:[%s750_s0 + $0xe0] sm:$0xff] }
   0xb   :  { %411 = vmatpush1.bf16.msra.mxu1 %v410_v26  ;;  %377 = vmatprep.subr.bf16.mxu0 %v376_v27  ;;  %v380_v40 = vpack.c.bf16 %v53_v37, %v49_v36  ;;  %v416_v44 = vpack.c.bf16 %v55_v41, %v51_v38  ;;  %v50_v45 = vld [vmem:[%s750_s0 + $0xd0] sm:$0xff]  ;;  %v57_v47 = vld [vmem:[%s750_s0 + $0x108] sm:$0xff]  ;;  %v59_v49 = vld [vmem:[%s750_s0 + $0x118] sm:$0xff]  ;;  %v382_v51 = vpack.c.bf16 %v52_v43, %v48_v42 }
   0xc   :  { %413 = vmatprep.subr.bf16.mxu1 %v412_v31  ;;  %v54_v46 = vld [vmem:[%s750_s0 + $0xf0] sm:$0xff]  ;;  %v61_v48 = vld [vmem:[%s750_s0 + $0x128] sm:$0xff]  ;;  %v63_v50 = vld [vmem:[%s750_s0 + $0x138] sm:$0xff] }
   0xd   :  { %v418_v52 = vpack.c.bf16 %v54_v46, %v50_v45  ;;  %v384_v53 = vpack.c.bf16 %v61_v48, %v57_v47  ;;  %v56_v54 = vld [vmem:[%s750_s0 + $0x100] sm:$0xff]  ;;  %v58_v56 = vld [vmem:[%s750_s0 + $0x110] sm:$0xff]  ;;  %v420_v57 = vpack.c.bf16 %v63_v50, %v59_v49  ;;  %v65_v59 = vld [vmem:[%s750_s0 + $0x148] sm:$0xff] }
   0xe   :  { %379 = vmatpush1.bf16.msra.mxu0 %v378_v35  ;;  %v60_v55 = vld [vmem:[%s750_s0 + $0x120] sm:$0xff]  ;;  %v62_v58 = vld [vmem:[%s750_s0 + $0x130] sm:$0xff]  ;;  %v69_v60 = vld [vmem:[%s750_s0 + $0x168] sm:$0xff] }
   0xf   :  { %415 = vmatpush1.bf16.msra.mxu1 %v414_v39  ;;  %381 = vmatprep.subr.bf16.mxu0 %v380_v40  ;;  %v67_v61 = vld [vmem:[%s750_s0 + $0x158] sm:$0xff]  ;;  %v386_v63 = vpack.c.bf16 %v60_v55, %v56_v54  ;;  %v422_v0 = vpack.c.bf16 %v62_v58, %v58_v56  ;;  %v388_v1 = vpack.c.bf16 %v69_v60, %v65_v59  ;;  %v64_v2 = vld [vmem:[%s750_s0 + $0x140] sm:$0xff]  ;;  %v66_v4 = vld [vmem:[%s750_s0 + $0x150] sm:$0xff]  ;;  %v296_v56 = vlaneseq }
  0x10   :  { %417 = vmatprep.subr.bf16.mxu1 %v416_v44  ;;  %v71_v62 = vld [vmem:[%s750_s0 + $0x178] sm:$0xff]  ;;  %v68_v3 = vld [vmem:[%s750_s0 + $0x160] sm:$0xff]  ;;  %v70_v6 = vld [vmem:[%s750_s0 + $0x170] sm:$0xff] }
  0x11   :  { %v424_v5 = vpack.c.bf16 %v71_v62, %v67_v61  ;;  %v73_v7 = vld [vmem:[%s750_s0 + $0x188] sm:$0xff]  ;;  %v75_v9 = vld [vmem:[%s750_s0 + $0x198] sm:$0xff]  ;;  %v390_v11 = vpack.c.bf16 %v68_v3, %v64_v2  ;;  %v426_v12 = vpack.c.bf16 %v70_v6, %v66_v4  ;;  %v72_v14 = vld [vmem:[%s750_s0 + $0x180] sm:$0xff] }
  0x12   :  { %383 = vmatpush1.bf16.msra.mxu0 %v382_v51  ;;  %v77_v8 = vld [vmem:[%s750_s0 + $0x1a8] sm:$0xff]  ;;  %v79_v10 = vld [vmem:[%s750_s0 + $0x1b8] sm:$0xff]  ;;  %v76_v15 = vld [vmem:[%s750_s0 + $0x1a0] sm:$0xff] }
  0x13   :  { %419 = vmatpush1.bf16.msra.mxu1 %v418_v52  ;;  %385 = vmatprep.subr.bf16.mxu0 %v384_v53  ;;  %v392_v13 = vpack.c.bf16 %v77_v8, %v73_v7  ;;  %v74_v16 = vld [vmem:[%s750_s0 + $0x190] sm:$0xff]  ;;  %v428_v17 = vpack.c.bf16 %v79_v10, %v75_v9  ;;  %v81_v19 = vld [vmem:[%s750_s0 + $0x1c8] sm:$0xff]  ;;  %v83_v21 = vld [vmem:[%s750_s0 + $0x1d8] sm:$0xff]  ;;  %v394_v23 = vpack.c.bf16 %v76_v15, %v72_v14 }
  0x14   :  { %421 = vmatprep.subr.bf16.mxu1 %v420_v57  ;;  %v78_v18 = vld [vmem:[%s750_s0 + $0x1b0] sm:$0xff]  ;;  %v85_v20 = vld [vmem:[%s750_s0 + $0x1e8] sm:$0xff]  ;;  %v87_v22 = vld [vmem:[%s750_s0 + $0x1f8] sm:$0xff] }
  0x15   :  { %v80_v24 = vld [vmem:[%s750_s0 + $0x1c0] sm:$0xff]  ;;  %v430_v26 = vpack.c.bf16 %v78_v18, %v74_v16  ;;  %v396_v27 = vpack.c.bf16 %v85_v20, %v81_v19  ;;  %v82_v28 = vld [vmem:[%s750_s0 + $0x1d0] sm:$0xff]  ;;  %v21_v30 = vld [vmem:[%s751_s1 + $0x8] sm:$0xff]  ;;  %v432_v31 = vpack.c.bf16 %v87_v22, %v83_v21 }
  0x16   :  { %387 = vmatpush1.bf16.msra.mxu0 %v386_v63  ;;  %v84_v25 = vld [vmem:[%s750_s0 + $0x1e0] sm:$0xff]  ;;  %v86_v29 = vld [vmem:[%s750_s0 + $0x1f0] sm:$0xff]  ;;  %v89_v32 = vld [vmem:[%s750_s0 + $0x208] sm:$0xff]  ;;  %362 = vmatprep.mubr.msk.f32.mxu0 %vm100_vm0, %v21_v30 }
  0x17   :  { %423 = vmatpush1.bf16.msra.mxu1 %v422_v0  ;;  %389 = vmatprep.subr.bf16.mxu0 %v388_v1  ;;  %v93_v33 = vld [vmem:[%s750_s0 + $0x228] sm:$0xff]  ;;  %v280_v34 = vld [vmem:[%s752_s2] sm:$0xff]  ;;  %v91_v35 = vld [vmem:[%s750_s0 + $0x218] sm:$0xff]  ;;  %v398_v37 = vpack.c.bf16 %v84_v25, %v80_v24  ;;  %v434_v39 = vpack.c.bf16 %v86_v29, %v82_v28  ;;  %v297_v0 = vand.u32 127, %v296_v56 }
  0x18   :  { %425 = vmatprep.subr.bf16.mxu1 %v424_v5  ;;  %v95_v36 = vld [vmem:[%s750_s0 + $0x238] sm:$0xff]  ;;  %366 = vmatprep.mubr.msk.f32.mxu1 %vm100_vm0, %v21_v30  ;;  %v281_v38 = vld [vmem:[%s752_s2 + $0x8] sm:$0xff]  ;;  %v400_v40 = vpack.c.bf16 %v93_v33, %v89_v32  ;;  %v88_v41 = vld [vmem:[%s750_s0 + $0x200] sm:$0xff] }
  0x19   :  { %284 = vperm.xlu0 %441, %v280_v34   ;;  %v92_v42 = vld [vmem:[%s750_s0 + $0x220] sm:$0xff]  ;;  %v436_v43 = vpack.c.bf16 %v95_v36, %v91_v35  ;;  %v90_v44 = vld [vmem:[%s750_s0 + $0x210] sm:$0xff]  ;;  %v97_v48 = vld [vmem:[%s750_s0 + $0x248] sm:$0x3f]  ;;  %vm298_vm2 = vcmp.lt.s32.totalorder %v297_v0, 50 }
  0x1a   :  { %391 = vmatpush1.bf16.msra.mxu0 %v390_v11  ;;  %v94_v45 = vld [vmem:[%s750_s0 + $0x230] sm:$0xff]  ;;  %v402_v46 = vpack.c.bf16 %v92_v42, %v88_v41  ;;  %v99_v49 = vld [vmem:[%s750_s0 + $0x258] sm:$0x3f]  ;;  %v96_v50 = vld [vmem:[%s750_s0 + $0x240] sm:$0x3f] }
  0x1b   :  { %427 = vmatpush1.bf16.msra.mxu1 %v426_v12  ;;  %393 = vmatprep.subr.bf16.mxu0 %v392_v13  ;;  %v438_v47 = vpack.c.bf16 %v94_v45, %v90_v44  ;;  %v98_v51 = vld [vmem:[%s750_s0 + $0x250] sm:$0x3f]  ;;  %v20_v52 = vld [vmem:[%s751_s1] sm:$0xff]  ;;  %v23_v53 = vld [vmem:[%s751_s1 + $0x18] sm:$0xff] }
  0x1c   :  { %429 = vmatprep.subr.bf16.mxu1 %v428_v17  ;;  %v22_v54 = vld [vmem:[%s751_s1 + $0x10] sm:$0xff]  ;;  %v326_v15 = vld [vmem:[%s753_s3] sm:$0xff]  ;;  %v327_v16 = vld [vmem:[%s753_s3 + $0x8] sm:$0xff] }
  0x1d   :  { %289 = vperm.xlu0 %441, %v281_v38   ;;  %v340_v17 = vld [vmem:[%s754_s4] sm:$0xff]  ;;  %v341_v28 = vld [vmem:[%s754_s4 + $0x8] sm:$0xff] }
  0x1e   :  { %395 = vmatpush1.bf16.msra.mxu0 %v394_v23 }
  0x1f   :  { %431 = vmatpush1.bf16.msra.mxu1 %v430_v26  ;;  %397 = vmatprep.subr.bf16.mxu0 %v396_v27 }
  0x20   :  { %433 = vmatprep.subr.bf16.mxu1 %v432_v31 }
  0x22   :  { %399 = vmatpush1.bf16.msra.mxu0 %v398_v37 }
  0x23   :  { %435 = vmatpush1.bf16.msra.mxu1 %v434_v39  ;;  %401 = vmatprep.subr.bf16.mxu0 %v400_v40 }
  0x24   :  { %437 = vmatprep.subr.bf16.mxu1 %v436_v43 }
  0x26   :  { %403 = vmatpush1.bf16.msra.mxu0 %v402_v46 }
  0x27   :  { %439 = vmatpush1.bf16.msra.mxu1 %v438_v47  ;;  %360 = vmatprep.subr.msk.mxu0 %vm107_vm1, %v97_v48 }
  0x28   :  { %364 = vmatprep.subr.msk.mxu1 %vm107_vm1, %v99_v49 }
  0x2a   :  { %361 = vmatpush1.msk.msra.mxu0 %vm107_vm1, %v96_v50 }
  0x2b   :  { %365 = vmatpush1.msk.msra.mxu1 %vm107_vm1, %v98_v51  ;;  %185 = vmatmul.mubr.f32.vlgmr.msra.gmra.mrb[0].mxu0 %v20_v52 }
  0x2c   :  { %262 = vmatmul.mubr.f32.vlgmr.msra.gmra.mrb[0].mxu1 %v20_v52  ;;  %363 = vmatprep.mubr.msk.f32.mxu0 %vm100_vm0, %v23_v53 }
  0x2d   :  { %367 = vmatprep.mubr.msk.f32.mxu1 %vm100_vm0, %v23_v53 }
  0x2f   :  { %191 = vmatmul.mubr.f32.gmra.mrb[2].mxu0 %v22_v54 }
  0x30   :  { %268 = vmatmul.mubr.f32.gmra.mrb[2].mxu1 %v22_v54 }
  0x98   :  { %v285_v62 = vpop.permute.xlu0 %284 }
  0x9c   :  { %v290_v10 = vpop.permute.xlu0 %289 }
  0xfe   :  { %v186_v55 = vpop.f32.mrb[0].mxu0 }
  0xff   :  { %v263_v57 = vpop.f32.mrb[0].mxu1  ;;  %v188_v58 = vpop.f32.mrb[1].mxu0 }
 0x100   :  { %v274_v59 = vmax.f32 %v186_v55, %v188_v58  ;;  %v265_v60 = vpop.f32.mrb[1].mxu1 }
 0x101   :  { %v276_v61 = vmax.f32 %v263_v57, %v265_v60 }
 0x102   :  { %v192_v63 = vpop.f32.mrb[2].mxu0 }
 0x103   :  { %v278_v1 = vmax.f32 %v274_v59, %v276_v61  ;;  %v269_v2 = vpop.f32.mrb[2].mxu1  ;;  %v194_v3 = vpop.f32.mrb[3].mxu0 }
 0x104   :  { %v275_v4 = vmax.f32 %v192_v63, %v194_v3  ;;  %v271_v5 = vpop.f32.mrb[3].mxu1 }
 0x105   :  { %v277_v6 = vmax.f32 %v269_v2, %v271_v5  ;;  %v292_v7 = vadd.f32 %v285_v62, %v278_v1 }
 0x107   :  { %v279_v8 = vmax.f32 %v275_v4, %v277_v6  ;;  %v294_v9 = vmax.f32 %v292_v7, 0.0 }
 0x109   :  { %v299_v11 = vsel %vm298_vm2, %v294_v9, 0.0  ;;  %v293_v12 = vadd.f32 %v290_v10, %v279_v8 }
 0x10a   :  { %301 = vadd.xlane.f32.xlu1 %v299_v11 }
 0x10b   :  { %v295_v13 = vmax.f32 %v293_v12, 0.0 }
 0x10d   :  { %v300_v14 = vsel %vm298_vm2, %v295_v13, 0.0 }
 0x10e   :  { %303 = vadd.xlane.f32.xlu1 %v300_v14 }
 0x11f   :  { %330 = vperm.xlu1 %442, %v326_v15  }
 0x123   :  { %335 = vperm.xlu1 %442, %v327_v16  }
 0x127   :  { %344 = vperm.xlu1 %442, %v340_v17  }
 0x197   :  { %v302_v18 = vpop.xlane.xlu1 %301 }
 0x198   :  { %v306_v19 = vmul.f32 0.02, %v302_v18 }
 0x19a   :  { %v308_v20 = vsub.f32 %v294_v9, %v306_v19 }
 0x19b   :  { %v304_v21 = vpop.xlane.xlu1 %303 }
 0x19c   :  { %v307_v22 = vmul.f32 0.02, %v304_v21  ;;  %v310_v23 = vsel %vm298_vm2, %v308_v20, 0.0 }
 0x19d   :  { %v312_v24 = vmul.f32 %v310_v23, %v310_v23 }
 0x19e   :  { %v309_v25 = vsub.f32 %v295_v13, %v307_v22 }
 0x19f   :  { %314 = vadd.xlane.f32.xlu0 %v312_v24  ;;  %v331_v29 = vpop.permute.xlu1 %330 }
 0x1a0   :  { %v311_v26 = vsel %vm298_vm2, %v309_v25, 0.0 }
 0x1a1   :  { %v313_v27 = vmul.f32 %v311_v26, %v311_v26 }
 0x1a3   :  { %316 = vadd.xlane.f32.xlu1 %v313_v27  ;;  %v336_v30 = vpop.permute.xlu1 %335 }
 0x1a7   :  { %v345_v31 = vpop.permute.xlu1 %344 }
 0x1b4   :  { %349 = vperm.xlu1 %442, %v341_v28  }
 0x22c   :  { %v315_v32 = vpop.xlane.xlu0 %314 }
 0x22d   :  { %v318_v33 = vmul.f32 0.02, %v315_v32 }
 0x22f   :  { %v320_v34 = vadd.f32 1e-05, %v318_v33 }
 0x230   :  { %v317_v35 = vpop.xlane.xlu1 %316 }
 0x231   :  { %443 = vrsqrt.f32 %v320_v34  ;;  %v319_v36 = vmul.f32 0.02, %v317_v35 }
 0x233   :  { %v321_v37 = vadd.f32 1e-05, %v319_v36 }
 0x234   :  { %v350_v45 = vpop.permute.xlu1 %349 }
 0x235   :  { %445 = vrsqrt.f32 %v321_v37 }
 0x23b   :  { %v444_v38 = vpop.eup %443 }
 0x23c   :  { %v324_v39 = vmul.f32 %v444_v38, %v308_v20 }
 0x23e   :  { %v338_v40 = vmul.f32 %v331_v29, %v324_v39 }
 0x23f   :  { %v446_v41 = vpop.eup %445 }
 0x240   :  { %v325_v42 = vmul.f32 %v446_v41, %v309_v25  ;;  %v352_v43 = vadd.f32 %v345_v31, %v338_v40 }
 0x242   :  { %v339_v44 = vmul.f32 %v336_v30, %v325_v42  ;;  %354 = vst [vmem:[%s755_s5] sm:$0xff] %v352_v43 }
 0x244   :  { %v353_v46 = vadd.f32 %v350_v45, %v339_v44 }
 0x246   :  { %355 = vst [vmem:[%s755_s5 + $0x8] sm:$0xff] %v353_v46 }

// kernel: lenet_forward.5
= control target key start
LH: loop header
LB: loop body
LE: loop exit
PB: predicated region body
PF: predicated region fallthrough
CT: control target
= control target key end

     0   :  { %v711_v4 = vmov 0.0|0.0   ;;  %v712_v26 = vmov 1983009808   ;;  %v90_v28 = vlaneseq  ;;  %vm106_vm0 = vcmask 130048   ;;  %s1029_s0 = inlined_call_operand.vmem [shape: f32[2,400], index: 0, kind: input, shape index: {}]   ;;  %s1030_s1 = inlined_call_operand.vmem [shape: f32[400,120], index: 1, kind: input, shape index: {}]   ;;  %s1031_s2 = inlined_call_operand.vmem [shape: f32[1,120], index: 2, kind: input, shape index: {}]   ;;  %s1032_s3 = inlined_call_operand.vmem [shape: f32[120,84], index: 3, kind: input, shape index: {}]   ;;  %s1033_s4 = inlined_call_operand.vmem [shape: f32[1,84], index: 4, kind: input, shape index: {}]   ;;  %s1034_s5 = inlined_call_operand.vmem [shape: f32[84,128], index: 5, kind: input, shape index: {}]   ;;  %s1035_s6 = inlined_call_operand.vmem [shape: f32[1,128], index: 6, kind: input, shape index: {}]   ;;  %s1036_s7 = inlined_call_operand.hbm [shape: f32[2,128], index: 7, kind: output, shape index: {}]  }
   0x1   :  { %v44_v0 = vld [vmem:[%s1030_s1 + $0x80] sm:$0xff]  ;;  %v45_v1 = vld [vmem:[%s1030_s1 + $0x88] sm:$0xff]  ;;  %618 = vmatprep.subr.bf16.mxu1 %v711_v4  ;;  %v46_v10 = vld [vmem:[%s1030_s1 + $0x90] sm:$0xff]  ;;  %v88_v27 = vunpack.c.l.s4 %v712_v26 }
   0x2   :  { %v28_v2 = vld [vmem:[%s1030_s1] sm:$0xff]  ;;  %v586_v3 = vpack.c.bf16 %v45_v1, %v44_v0  ;;  %v29_v5 = vld [vmem:[%s1030_s1 + $0x8] sm:$0xff]  ;;  %v47_v11 = vld [vmem:[%s1030_s1 + $0x98] sm:$0xff]  ;;  %v91_v39 = vshrl.u32 %v90_v28, 7 }
   0x3   :  { %v60_v6 = vld [vmem:[%s1030_s1 + $0x100] sm:$0xff]  ;;  %v61_v7 = vld [vmem:[%s1030_s1 + $0x108] sm:$0xff]  ;;  %v588_v8 = vpack.c.bf16 %v29_v5, %v28_v2  ;;  %v30_v12 = vld [vmem:[%s1030_s1 + $0x10] sm:$0xff]  ;;  %v590_v13 = vpack.c.bf16 %v47_v11, %v46_v10  ;;  %v89_v38 = vunpack.c.0.s8 %v88_v27 }
   0x4   :  { %v619_v9 = vpack.c.bf16 %v61_v7, %v60_v6  ;;  %587 = vmatprep.subr.bf16.mxu0 %v586_v3  ;;  %v31_v14 = vld [vmem:[%s1030_s1 + $0x18] sm:$0xff]  ;;  %v62_v15 = vld [vmem:[%s1030_s1 + $0x110] sm:$0xff]  ;;  %v48_v19 = vld [vmem:[%s1030_s1 + $0xa0] sm:$0xff] }
   0x5   :  { %v63_v16 = vld [vmem:[%s1030_s1 + $0x118] sm:$0xff]  ;;  %589 = vmatpush3.bf16.msra.mxu0 %v588_v8  ;;  %v592_v17 = vpack.c.bf16 %v31_v14, %v30_v12  ;;  %v49_v20 = vld [vmem:[%s1030_s1 + $0xa8] sm:$0xff]  ;;  %v32_v21 = vld [vmem:[%s1030_s1 + $0x20] sm:$0xff]  ;;  %v92_v49 = vsub.s32 %v89_v38, %v91_v39 }
   0x6   :  { %620 = vmatpush1.bf16.msra.mxu1 %v619_v9  ;;  %v622_v18 = vpack.c.bf16 %v63_v16, %v62_v15  ;;  %591 = vmatprep.subr.bf16.mxu0 %v590_v13  ;;  %v594_v22 = vpack.c.bf16 %v49_v20, %v48_v19  ;;  %v33_v23 = vld [vmem:[%s1030_s1 + $0x28] sm:$0xff]  ;;  %v64_v24 = vld [vmem:[%s1030_s1 + $0x120] sm:$0xff]  ;;  %v50_v29 = vld [vmem:[%s1030_s1 + $0xb0] sm:$0xff] }
   0x7   :  { %621 = vmatprep.subr.bf16.mxu1 %v711_v4  ;;  %v65_v25 = vld [vmem:[%s1030_s1 + $0x128] sm:$0xff]  ;;  %v51_v30 = vld [vmem:[%s1030_s1 + $0xb8] sm:$0xff]  ;;  %v596_v31 = vpack.c.bf16 %v33_v23, %v32_v21  ;;  %v34_v33 = vld [vmem:[%s1030_s1 + $0x30] sm:$0xff] }
   0x8   :  { %v625_v32 = vpack.c.bf16 %v65_v25, %v64_v24  ;;  %v598_v34 = vpack.c.bf16 %v51_v30, %v50_v29  ;;  %v35_v35 = vld [vmem:[%s1030_s1 + $0x38] sm:$0xff]  ;;  %v66_v36 = vld [vmem:[%s1030_s1 + $0x130] sm:$0xff]  ;;  %v52_v40 = vld [vmem:[%s1030_s1 + $0xc0] sm:$0xff] }
   0x9   :  { %593 = vmatpush3.bf16.msra.mxu0 %v592_v17  ;;  %v67_v37 = vld [vmem:[%s1030_s1 + $0x138] sm:$0xff]  ;;  %v53_v41 = vld [vmem:[%s1030_s1 + $0xc8] sm:$0xff]  ;;  %v600_v42 = vpack.c.bf16 %v35_v35, %v34_v33  ;;  %v36_v44 = vld [vmem:[%s1030_s1 + $0x40] sm:$0xff] }
   0xa   :  { %623 = vmatpush1.bf16.msra.mxu1 %v622_v18  ;;  %595 = vmatprep.subr.bf16.mxu0 %v594_v22  ;;  %v628_v43 = vpack.c.bf16 %v67_v37, %v66_v36  ;;  %v602_v45 = vpack.c.bf16 %v53_v41, %v52_v40  ;;  %v37_v46 = vld [vmem:[%s1030_s1 + $0x48] sm:$0xff]  ;;  %v68_v47 = vld [vmem:[%s1030_s1 + $0x140] sm:$0xff]  ;;  %v54_v50 = vld [vmem:[%s1030_s1 + $0xd0] sm:$0xff] }
   0xb   :  { %624 = vmatprep.subr.bf16.mxu1 %v711_v4  ;;  %v69_v48 = vld [vmem:[%s1030_s1 + $0x148] sm:$0xff]  ;;  %v55_v51 = vld [vmem:[%s1030_s1 + $0xd8] sm:$0xff]  ;;  %v604_v52 = vpack.c.bf16 %v37_v46, %v36_v44  ;;  %v38_v54 = vld [vmem:[%s1030_s1 + $0x50] sm:$0xff] }
   0xc   :  { %v631_v53 = vpack.c.bf16 %v69_v48, %v68_v47  ;;  %v27_v55 = vld [vmem:[%s1029_s0] sm:$0xff]  ;;  %v606_v56 = vpack.c.bf16 %v55_v51, %v54_v50  ;;  %v39_v57 = vld [vmem:[%s1030_s1 + $0x58] sm:$0xff]  ;;  %v70_v58 = vld [vmem:[%s1030_s1 + $0x150] sm:$0xff] }
   0xd   :  { %597 = vmatpush3.bf16.msra.mxu0 %v596_v31  ;;  %v71_v59 = vld [vmem:[%s1030_s1 + $0x158] sm:$0xff]  ;;  %v86_v60 = vcombine.high %v27_v55, %v27_v55  ;;  %v93_v61 = vrot.slane %v27_v55, %v92_v49  ;;  %v56_v62 = vld [vmem:[%s1030_s1 + $0xe0] sm:$0xff]  ;;  %v57_v63 = vld [vmem:[%s1030_s1 + $0xe8] sm:$0xff]  ;;  %v608_v2 = vpack.c.bf16 %v39_v57, %v38_v54 }
   0xe   :  { %626 = vmatpush1.bf16.msra.mxu1 %v625_v32  ;;  %599 = vmatprep.subr.bf16.mxu0 %v598_v34  ;;  %v634_v3 = vpack.c.bf16 %v71_v59, %v70_v58  ;;  %v40_v5 = vld [vmem:[%s1030_s1 + $0x60] sm:$0xff] }
   0xf   :  { %627 = vmatprep.subr.bf16.mxu1 %v711_v4  ;;  %v101_v0 = vcombine.high %v93_v61, %v93_v61  ;;  %v100_v1 = vrot.slane %v86_v60, %v92_v49 }
  0x11   :  { %601 = vmatpush3.bf16.msra.mxu0 %v600_v42 }
  0x12   :  { %629 = vmatpush1.bf16.msra.mxu1 %v628_v43  ;;  %603 = vmatprep.subr.bf16.mxu0 %v602_v45 }
  0x13   :  { %630 = vmatprep.subr.bf16.mxu1 %v711_v4 }
  0x15   :  { %605 = vmatpush3.bf16.msra.mxu0 %v604_v52 }
  0x16   :  { %632 = vmatpush1.bf16.msra.mxu1 %v631_v53 }
  0x17   :  { %12 = vsyncpa [#allocation3], 0  ;;  %607 = vmatprep.subr.bf16.mxu0 %v606_v56  ;;  %633 = vmatprep.subr.bf16.mxu1 %v711_v4  ;;  %v610_v6 = vpack.c.bf16 %v57_v63, %v56_v62  ;;  %v41_v7 = vld [vmem:[%s1030_s1 + $0x68] sm:$0xff]  ;;  %v72_v8 = vld [vmem:[%s1030_s1 + $0x160] sm:$0xff]  ;;  %v102_v10 = vcombine.high %v100_v1, %v100_v1  ;;  %v713_v46 = vmov 0.0   ;;  %vm714_vm1 = vmmov 0  }
  0x18   :  { %v73_v9 = vld [vmem:[%s1030_s1 + $0x168] sm:$0xff]  ;;  %v58_v11 = vld [vmem:[%s1030_s1 + $0xf0] sm:$0xff]  ;;  %v59_v12 = vld [vmem:[%s1030_s1 + $0xf8] sm:$0xff]  ;;  %173 = vmatprep.mubr.f32.mxu0 %v101_v0  ;;  %v612_v13 = vpack.c.bf16 %v41_v7, %v40_v5  ;;  %vm272_vm2 = vcmask 982016   ;;  %vm369_vm3 = vcmask 1043456   ;;  %vm365_vm4 = vcmask 687104  }
  0x19   :  { %459 = vmatprep.mubr.msk.f32.mxu1 %vm106_vm0, %v102_v10  ;;  %609 = vmatpush3.bf16.msra.mxu0 %v608_v2  ;;  %v637_v14 = vpack.c.bf16 %v73_v9, %v72_v8  ;;  %v42_v15 = vld [vmem:[%s1030_s1 + $0x70] sm:$0xff]  ;;  %v614_v16 = vpack.c.bf16 %v59_v12, %v58_v11  ;;  %v43_v17 = vld [vmem:[%s1030_s1 + $0x78] sm:$0xff]  ;;  %v76_v22 = vld [vmem:[%s1030_s1 + $0x180] sm:$0xff] }
  0x1a   :  { %635 = vmatpush1.bf16.msra.mxu1 %v634_v3  ;;  %611 = vmatprep.subr.bf16.mxu0 %v610_v6  ;;  %v74_v18 = vld [vmem:[%s1030_s1 + $0x170] sm:$0xff]  ;;  %v75_v19 = vld [vmem:[%s1030_s1 + $0x178] sm:$0xff]  ;;  %v616_v20 = vpack.c.bf16 %v43_v17, %v42_v15  ;;  %v77_v23 = vld [vmem:[%s1030_s1 + $0x188] sm:$0xff]  ;;  %s715_s1 = smov [#allocation2]  }
  0x1b   :  { %636 = vmatprep.subr.bf16.mxu1 %v711_v4  ;;  %v640_v21 = vpack.c.bf16 %v75_v19, %v74_v18  ;;  %v250_v24 = vld [vmem:[%s1032_s3] sm:$0xff]  ;;  %v251_v25 = vld [vmem:[%s1032_s3 + $0x8] sm:$0xff]  ;;  %v643_v26 = vpack.c.bf16 %v77_v23, %v76_v22  ;;  %v252_v28 = vld [vmem:[%s1032_s3 + $0x10] sm:$0xff]  ;;  %s450_s15 = sshll.u32 %s715_s1, 4  ;;  %s451_s15 = int_to_ptr.vmem [resolvable:$true] %s450_s15 }
  0x1c   :  { %v646_v27 = vpack.c.bf16 %v251_v25, %v250_v24  ;;  %v253_v29 = vld [vmem:[%s1032_s3 + $0x18] sm:$0xff]  ;;  %v254_v31 = vld [vmem:[%s1032_s3 + $0x20] sm:$0xff]  ;;  %v255_v32 = vld [vmem:[%s1032_s3 + $0x28] sm:$0xff]  ;;  %p692_p1 = scmp.lt.s32.totalorder %s451_s15, %s451_s15 }
  0x1d   :  { %613 = vmatpush3.bf16.msra.mxu0 %v612_v13  ;;  %v649_v30 = vpack.c.bf16 %v253_v29, %v252_v28  ;;  %v652_v33 = vpack.c.bf16 %v255_v32, %v254_v31  ;;  %v256_v34 = vld [vmem:[%s1032_s3 + $0x30] sm:$0xff]  ;;  %v257_v35 = vld [vmem:[%s1032_s3 + $0x38] sm:$0xff]  ;;  %v258_v37 = vld [vmem:[%s1032_s3 + $0x40] sm:$0xff] }
  0x1e   :  { %638 = vmatpush1.bf16.msra.mxu1 %v637_v14  ;;  %615 = vmatprep.subr.bf16.mxu0 %v614_v16  ;;  %v655_v36 = vpack.c.bf16 %v257_v35, %v256_v34  ;;  %v259_v38 = vld [vmem:[%s1032_s3 + $0x48] sm:$0xff]  ;;  %v260_v40 = vld [vmem:[%s1032_s3 + $0x50] sm:$0xff]  ;;  %v261_v41 = vld [vmem:[%s1032_s3 + $0x58] sm:$0xff] }
  0x1f   :  { %639 = vmatprep.subr.bf16.mxu1 %v711_v4  ;;  %v658_v39 = vpack.c.bf16 %v259_v38, %v258_v37  ;;  %v661_v42 = vpack.c.bf16 %v261_v41, %v260_v40  ;;  %v262_v43 = vld [vmem:[%s1032_s3 + $0x60] sm:$0xff]  ;;  %v263_v44 = vld [vmem:[%s1032_s3 + $0x68] sm:$0xff]  ;;  %v264_v47 = vld [vmem:[%s1032_s3 + $0x70] sm:$0xff] }
  0x20   :  { %v664_v45 = vpack.c.bf16 %v263_v44, %v262_v43  ;;  %v347_v48 = vld [vmem:[%s1034_s5] sm:$0xff]  ;;  %v348_v49 = vld [vmem:[%s1034_s5 + $0x8] sm:$0xff]  ;;  %v349_v50 = vld [vmem:[%s1034_s5 + $0x10] sm:$0xff] }
  0x21   :  { %617 = vmatpush3.bf16.msra.mxu0 %v616_v20  ;;  %v667_v51 = vpack.c.bf16 %v348_v49, %v347_v48  ;;  %v350_v52 = vld [vmem:[%s1034_s5 + $0x18] sm:$0xff]  ;;  %v351_v54 = vld [vmem:[%s1034_s5 + $0x20] sm:$0xff]  ;;  %v352_v55 = vld [vmem:[%s1034_s5 + $0x28] sm:$0xff] }
  0x22   :  { %641 = vmatpush1.bf16.msra.mxu1 %v640_v21  ;;  %645 = vmatprep.subr.bf16.mxu0 %v711_v4  ;;  %v670_v53 = vpack.c.bf16 %v350_v52, %v349_v50  ;;  %v673_v56 = vpack.c.bf16 %v352_v55, %v351_v54  ;;  %v353_v57 = vld [vmem:[%s1034_s5 + $0x30] sm:$0xff]  ;;  %v354_v58 = vld [vmem:[%s1034_s5 + $0x38] sm:$0xff]  ;;  %v458_v62 = vld [vmem:[%s1031_s2] ss:$0 sm:$0xff] }
  0x23   :  { %642 = vmatprep.subr.bf16.mxu1 %v711_v4  ;;  %v676_v59 = vpack.c.bf16 %v354_v58, %v353_v57  ;;  %v355_v6 = vld [vmem:[%s1034_s5 + $0x40] sm:$0xff]  ;;  %v357_v8 = vld [vmem:[%s1034_s5 + $0x50] sm:$0xf] }
  0x24   :  { %174 = vmatmul.mubr.f32.vlgmr.msra.gmra.mrb[0].mxu0 %v93_v61  ;;  %v460_v9 = vld [vmem:[%s1033_s4] ss:$0 sm:$0xff] }
  0x25   :  { %647 = vmatpush3.bf16.msra.mxu0 %v646_v27  ;;  %558 = vmatprep.mubr.msk.f32.mxu0 %vm714_vm1, %v713_v46  ;;  %v462_v14 = vld [vmem:[%s1035_s6] ss:$0 sm:$0xff] }
  0x26   :  { %644 = vmatpush1.bf16.msra.mxu1 %v643_v26  ;;  %648 = vmatprep.subr.bf16.mxu0 %v711_v4 }
  0x27   :  { %666 = vmatprep.subr.bf16.mxu1 %v711_v4 }
  0x29   :  { %244 = vmatmul.mubr.f32.vlgmr.msra.gmra.mrb[0].mxu1 %v100_v1  ;;  %650 = vmatpush3.bf16.msra.mxu0 %v649_v30 }
  0x2a   :  { %651 = vmatprep.subr.bf16.mxu0 %v711_v4  ;;  %583 = vmatprep.mubr.msk.f32.mxu1 %vm714_vm1, %v713_v46 }
  0x2b   :  { %668 = vmatpush3.bf16.msra.mxu1 %v667_v51 }
  0x2c   :  { %669 = vmatprep.subr.bf16.mxu1 %v711_v4 }
  0x2d   :  { %653 = vmatpush3.bf16.msra.mxu0 %v652_v33 }
  0x2e   :  { %654 = vmatprep.subr.bf16.mxu0 %v711_v4 }
  0x2f   :  { %671 = vmatpush3.bf16.msra.mxu1 %v670_v53 }
  0x30   :  { %672 = vmatprep.subr.bf16.mxu1 %v711_v4 }
  0x31   :  { %656 = vmatpush3.bf16.msra.mxu0 %v655_v36 }
  0x32   :  { %657 = vmatprep.subr.bf16.mxu0 %v711_v4 }
  0x33   :  { %674 = vmatpush3.bf16.msra.mxu1 %v673_v56 }
  0x34   :  { %675 = vmatprep.subr.bf16.mxu1 %v711_v4 }
  0x35   :  { %659 = vmatpush3.bf16.msra.mxu0 %v658_v39 }
  0x36   :  { %660 = vmatprep.subr.bf16.mxu0 %v711_v4 }
  0x37   :  { %677 = vmatpush3.bf16.msra.mxu1 %v676_v59 }
  0x38   :  { %678 = vmatprep.subr.bf16.mxu1 %v711_v4 }
  0x39   :  { %662 = vmatpush3.bf16.msra.mxu0 %v661_v42 }
  0x3a   :  { %663 = vmatprep.subr.bf16.mxu0 %v711_v4  ;;  %v356_v4 = vld [vmem:[%s1034_s5 + $0x48] sm:$0xff]  ;;  %s687_s5 = scalar_lea.vmem %s451_s15, 32 }
  0x3b   :  { %v679_v7 = vpack.c.bf16 %v356_v4, %v355_v6  ;;  %p688_p0 = scmp.ne.s32.totalorder %s451_s15, %s687_s5  ;;  %p693_p2 = scmp.lt.s32.totalorder %s687_s5, %s687_s5 }
  0x3d   :  { %665 = vmatpush3.bf16.msra.mxu0 %v664_v45  ;;  %680 = vmatpush3.bf16.msra.mxu1 %v679_v7  ;;  %p694_p3 = por %p693_p2, %p692_p1 }
  0x3e   :  { %556 = vmatprep.subr.mxu0 %v713_v46  ;;  %581 = vmatprep.subr.mxu1 %v713_v46 }
  0x3f   :  { %p695_p4 = pnand %p694_p3, %p688_p0 }
  0x41   :  { %557 = vmatpush3.msra.mxu0 %v264_v47  ;;  %582 = vmatpush3.msk.msra.mxu1 %vm369_vm3, %v357_v8 }
  0xf7   :  { %v497_v60 = vpop.f32.mrb[0].mxu0 }
  0xf8   :  { %v498_v61 = vpop.f32.mrb[1].mxu0 }
  0xf9   :  { %v499_v63 = vadd.f32 %v498_v61, %v497_v60 }
  0xfb   :  { %v176_v0 = vadd.f32 %v499_v63, %v458_v62 }
  0xfc   :  { %v245_v1 = vpop.f32.mrb[0].mxu1 }
  0xfd   :  { %v247_v2 = vpop.f32.mrb[1].mxu1  ;;  %v246_v3 = vadd.f32 %v245_v1, %v176_v0 }
  0xff   :  { %v249_v5 = vmax.f32 %v246_v3, 0.0 }
 0x101   :  { %559 = vmatmul.mubr.msk.f32.vlgmr.msra.gmra.mrb[2].mxu0 %vm272_vm2, %v249_v5 }
 0x1d4   :  { %v342_v10 = vpop.f32.mrb[2].mxu0 }
 0x1d5   :  { %v343_v11 = vadd.f32 %v460_v9, %v342_v10  ;;  %v560_v12 = vpop.f32.mrb[3].mxu0 }
 0x1d7   :  { %v346_v13 = vmax.f32 %v343_v11, 0.0 }
 0x1d9   :  { %584 = vmatmul.mubr.msk.f32.vlgmr.msra.gmra.mrb[2].mxu1 %vm365_vm4, %v346_v13 }
 0x2ac   :  { %v439_v15 = vpop.f32.mrb[2].mxu1 }
 0x2ad   :  { %v440_v16 = vadd.f32 %v462_v14, %v439_v15  ;;  %v585_v17 = vpop.f32.mrb[3].mxu1 }
 0x2af   :  { %443 = vst [vmem:[#allocation2] sm:$0x3] %v440_v16 }
 0x2b0   :  { %698 = shalt.err (!%p695_p4)
}
 0x2b1   :  { %s699_s17 = scalar_lea.hbm %s1036_s7, 32 }
 0x2b2   :  { %p700_p5 = scmp.ne.s32.totalorder %s1036_s7, %s699_s17  ;;  %p703_p6 = scmp.lt.u32.totalorder %s699_s17, %s1036_s7 }
 0x2b4   :  { %p705_p7 = pnand %p703_p6, %p700_p5 }
 0x2b6   :  { %708 = shalt.err (!%p705_p7)
}
 0x2b7   :  { %453 = dma.vmem_to_hbm [thread:$0]  %s451_s15, 32, %s1036_s7, [#allocation3]  }
 0x2b8   :  { %709 = dma.done.wait [#allocation3], 32  }
 0x2b9   :  { %710 = vsyncadd [#allocation3], 4294967264 }
 0x2ba   :  { %457 = vsyncpa [#allocation3], 1 }

</bundles_post_ra>
